<compile_context>
chip_gen: v5e
topology: v5e:2x2
jax: 0.10.0
libtpu: 0.0.40
codegen_flags: <defaults>
</compile_context>

<pallas_src>
import jax
import jax.numpy as jnp
from jax.experimental import pallas as pl
from jax.experimental.pallas import tpu as pltpu

# Make both the in-kernel MXU matmuls and the XLA reference matmuls run at full
# float32 accuracy so the correctness check against the jnp reference is
# meaningful (the module is an f32 PyTorch layer).
jax.config.update("jax_default_matmul_precision", "highest")

EMBEDDING_DIM = 32
ATTENTION_HEADS = 4
N = 8
HEAD_DIM = EMBEDDING_DIM // ATTENTION_HEADS
NEG_INF = -1e30                           # kills cross-head attention

# Power-of-two sizes let all the in-kernel index math use shifts / bit-ands,
# which lower cleanly to the VPU (no integer division).
assert ATTENTION_HEADS & (ATTENTION_HEADS - 1) == 0
assert N & (N - 1) == 0
assert HEAD_DIM & (HEAD_DIM - 1) == 0
LOG2_H = ATTENTION_HEADS.bit_length() - 1
LOG2_N = N.bit_length() - 1
LOG2_D = HEAD_DIM.bit_length() - 1


# ----------------------------- fused per-batch kernel -----------------------------

def _mha_kernel(x_ref, b_ref, wqkv_ref, wo_ref, o_ref):
    f32 = jnp.float32
    h, d, n, e = ATTENTION_HEADS, HEAD_DIM, N, EMBEDDING_DIM
    hn = h * n                               # 32 head-major rows per batch
    scale = 1.0 / float(d) ** 0.5

    x = x_ref[...]                           # (N, E)    embeddings of this batch
    b_small = b_ref[...]                     # (H*N, N)  B_matrix[b] as (h*N+n, m)
    wqkv = wqkv_ref[...]                     # (E, 3E)   [WQ | WK | WV]
    wo = wo_ref[...]                         # (E, E)

    # 1) fused QKV projection on the UN-replicated rows (MXU, M = N = 8).
    p = jnp.dot(x, wqkv, preferred_element_type=f32)                 # (N, 3E)

    # 2) The module's reshape(-1, H, N, d) means head-major row r = h*N + n
    #    reads projection row (r >> LOG2_H) and lane chunk (r & (H-1)).
    #    Sublane replication (x4) as a tiny 0/1 matmul on the MXU.
    rr = jax.lax.broadcasted_iota(jnp.int32, (hn, n), 0)
    cc = jax.lax.broadcasted_iota(jnp.int32, (hn, n), 1)
    rep = jnp.where((rr >> LOG2_H) == cc, 1.0, 0.0)                  # (H*N, N)
    p_rep = jnp.dot(rep, p, preferred_element_type=f32)              # (H*N, 3E)

    # 3) head-major Q/K/V (H*N, d): ONE pass, chunk masks shared by Q/K/V.
    chunk = jax.lax.broadcasted_iota(jnp.int32, (hn, d), 0) & (h - 1)
    q = jnp.zeros((hn, d), f32)
    k = jnp.zeros((hn, d), f32)
    v = jnp.zeros((hn, d), f32)
    for c in range(h):                       # H is a module constant (not batch)
        m = chunk == c
        q = q + jnp.where(m, p_rep[:, c * d:(c + 1) * d], 0.0)
        k = k + jnp.where(m, p_rep[:, e + c * d:e + (c + 1) * d], 0.0)
        v = v + jnp.where(m, p_rep[:, 2 * e + c * d:2 * e + (c + 1) * d], 0.0)

    # 4) all H heads at once: block-diagonal (H*N, H*N) score matrix; the
    #    -1e30 off-block bias is built in-kernel from iota block ids.
    s = jax.lax.dot_general(q, k, (((1,), (1,)), ((), ())),
                            preferred_element_type=f32)              # (H*N, H*N)
    row_head = jax.lax.broadcasted_iota(jnp.int32, (hn, hn), 0) >> LOG2_N
    col_head = jax.lax.broadcasted_iota(jnp.int32, (hn, hn), 1) >> LOG2_N
    b_tiled = jnp.concatenate([b_small] * h, axis=1)                 # (H*N, H*N)
    s = s * scale + jnp.where(row_head == col_head, b_tiled, NEG_INF)

    # 5) numerically stable softmax; off-block entries underflow to exactly 0.
    mx = jnp.max(s, axis=-1, keepdims=True)
    ex = jnp.exp(s - mx)
    attn = ex / jnp.sum(ex, axis=-1, keepdims=True)   # exact divide (tolerance)

    o = jnp.dot(attn, v, preferred_element_type=f32)                 # (H*N, d)

    # 6) permute(0,2,1,3).reshape + output projection as ONE matmul:
    #    lane-scatter o into (H*N, E) keyed on head = r >> LOG2_N, multiply by
    #    WO once, then fold the permute into a sum of the H row blocks.
    hid = jax.lax.broadcasted_iota(jnp.int32, (hn, e), 0) >> LOG2_N
    cid = jax.lax.broadcasted_iota(jnp.int32, (hn, e), 1) >> LOG2_D
    o_wide = jnp.where(hid == cid, jnp.concatenate([o] * h, axis=1), 0.0)
    proj = jnp.dot(o_wide, wo, preferred_element_type=f32)           # (H*N, E)
    acc = proj[0:n, :]
    for hh in range(1, h):
        acc = acc + proj[hh * n:(hh + 1) * n, :]
    o_ref[...] = acc                                                 # single (N, E) store


# ----------------------------- forward wrapper -----------------------------

def multi_head_attention(embeddings, b_matrix, WQ, WK, WV, WO):
    bsz = embeddings.shape[0]
    hn = ATTENTION_HEADS * N

    x2d = embeddings.reshape(bsz * N, EMBEDDING_DIM)      # free (contiguous) reshape
    b2d = b_matrix.reshape(bsz * hn, N)                   # free (contiguous) reshape
    w_qkv = jnp.concatenate([WQ, WK, WV], axis=1)         # (E, 3E); tiny one-off

    out2d = pl.pallas_call(
        _mha_kernel,
        out_shape=jax.ShapeDtypeStruct((bsz * N, EMBEDDING_DIM), jnp.float32),
        grid_spec=pltpu.PrefetchScalarGridSpec(
            num_scalar_prefetch=0,
            grid=(bsz,),
            in_specs=[
                pl.BlockSpec((N, EMBEDDING_DIM), lambda b: (b, 0)),              # x
                pl.BlockSpec((hn, N), lambda b: (b, 0)),                         # B_matrix
                pl.BlockSpec((EMBEDDING_DIM, 3 * EMBEDDING_DIM), lambda b: (0, 0)),  # WQKV
                pl.BlockSpec((EMBEDDING_DIM, EMBEDDING_DIM), lambda b: (0, 0)),      # WO
            ],
            out_specs=pl.BlockSpec((N, EMBEDDING_DIM), lambda b: (b, 0)),
        ),
        compiler_params=pltpu.CompilerParams(
            dimension_semantics=("parallel",)),            # v7x: shard batches over 2 TCs
    )(x2d, b2d, w_qkv, WO)

    return out2d.reshape(bsz, N, EMBEDDING_DIM)


# ----------------------------- reference (pure jnp) -----------------------------

def reference(embeddings, b_matrix, WQ, WK, WV, WO):
    bsz = embeddings.shape[0]
    Qh = (embeddings @ WQ).reshape(bsz, ATTENTION_HEADS, N, HEAD_DIM)
    Kh = (embeddings @ WK).reshape(bsz, ATTENTION_HEADS, N, HEAD_DIM)
    Vh = (embeddings @ WV).reshape(bsz, ATTENTION_HEADS, N, HEAD_DIM)
    att = jnp.einsum("bhqd,bhkd->bhqk", Qh, Kh) / jnp.sqrt(jnp.float32(HEAD_DIM))
    att = jax.nn.softmax(att + b_matrix, axis=-1)
    Hm = jnp.einsum("bhqk,bhkd->bhqd", att, Vh)
    Hm = jnp.transpose(Hm, (0, 2, 1, 3)).reshape(bsz, N, EMBEDDING_DIM)
    return Hm @ WO


# ----------------------------- params & main -----------------------------

def xavier_uniform(key, shape):
    fan_in, fan_out = shape
    bound = (6.0 / (fan_in + fan_out)) ** 0.5
    return jax.random.uniform(key, shape, jnp.float32, -bound, bound)


if __name__ == "__main__":
    B = 2
    root = jax.random.PRNGKey(0)
    k_q, k_k, k_v, k_o, k_x, k_b = jax.random.split(root, 6)

    WQ = xavier_uniform(k_q, (EMBEDDING_DIM, EMBEDDING_DIM))
    WK = xavier_uniform(k_k, (EMBEDDING_DIM, EMBEDDING_DIM))
    WV = xavier_uniform(k_v, (EMBEDDING_DIM, EMBEDDING_DIM))
    WO = xavier_uniform(k_o, (EMBEDDING_DIM, EMBEDDING_DIM))

    embeddings = jax.random.normal(k_x, (B, N, EMBEDDING_DIM), jnp.float32)
    B_matrix = 0.1 * jax.random.normal(
        k_b, (B, ATTENTION_HEADS, N, N), jnp.float32)

    mha = jax.jit(multi_head_attention)
    out = jax.block_until_ready(mha(embeddings, B_matrix, WQ, WK, WV, WO))

    ref = reference(embeddings, B_matrix, WQ, WK, WV, WO)
    assert out.shape == (B, N, EMBEDDING_DIM)
    assert jnp.allclose(out, ref, rtol=1e-3, atol=1e-3), "mismatch vs reference"

    print("KERNEL_OK")
</pallas_src>

<mosaic_0001>
module attributes {stable_mosaic.version = 11 : i64} {
  func.func @_mha_kernel(%arg0: i32, %arg1: memref<8x32xf32, #tpu.memory_space<vmem>>, %arg2: memref<32x8xf32, #tpu.memory_space<vmem>>, %arg3: memref<32x96xf32, #tpu.memory_space<vmem>>, %arg4: memref<32x32xf32, #tpu.memory_space<vmem>>, %arg5: memref<8x32xf32, #tpu.memory_space<vmem>>) attributes {dimension_semantics = [#tpu.dimension_semantics<parallel>], iteration_bounds = array<i64: 2>, scalar_prefetch = 0 : i64, scratch_operands = 0 : i64, tpu.core_type = #tpu.core_type<tc>, window_params = [{transform_indices = @transform_0, window_bounds = array<i64: 8, 32>}, {transform_indices = @transform_1, window_bounds = array<i64: 32, 8>}, {pipeline_mode = #tpu.pipeline_mode<synchronous>, transform_indices = @transform_2, window_bounds = array<i64: 32, 96>}, {pipeline_mode = #tpu.pipeline_mode<synchronous>, transform_indices = @transform_3, window_bounds = array<i64: 32, 32>}, {transform_indices = @transform_4, window_bounds = array<i64: 8, 32>}]} {
    %c0 = arith.constant 0 : index
    %c0_0 = arith.constant 0 : index
    %0 = vector.load %arg1[%c0, %c0_0] : memref<8x32xf32, #tpu.memory_space<vmem>>, vector<8x32xf32>
    %c0_1 = arith.constant 0 : index
    %c0_2 = arith.constant 0 : index
    %1 = vector.load %arg2[%c0_1, %c0_2] : memref<32x8xf32, #tpu.memory_space<vmem>>, vector<32x8xf32>
    %c0_3 = arith.constant 0 : index
    %c0_4 = arith.constant 0 : index
    %2 = vector.load %arg3[%c0_3, %c0_4] : memref<32x96xf32, #tpu.memory_space<vmem>>, vector<32x96xf32>
    %c0_5 = arith.constant 0 : index
    %c0_6 = arith.constant 0 : index
    %3 = vector.load %arg4[%c0_5, %c0_6] : memref<32x32xf32, #tpu.memory_space<vmem>>, vector<32x32xf32>
    %cst = arith.constant dense<0.000000e+00> : vector<8x96xf32>
    %4 = tpu.matmul %0, %2, %cst {dimension_numbers = #tpu.dot_dimension_numbers<[1], [0], [0], [1], [0, 0, 1, 1], [], []>, precision = #tpu.contract_precision<fp32>} : vector<8x32xf32>, vector<32x96xf32>, vector<8x96xf32> -> vector<8x96xf32>
    %5 = tpu.iota {dimensions = array<i32: 0>} : vector<32x8xi32>
    %6 = tpu.iota {dimensions = array<i32: 1>} : vector<32x8xi32>
    %c2_i32 = arith.constant 2 : i32
    %7 = vector.broadcast %c2_i32 : i32 to vector<32x8xi32>
    %8 = arith.shrsi %5, %7 : vector<32x8xi32>
    %9 = arith.cmpi eq, %8, %6 : vector<32x8xi32>
    %cst_7 = arith.constant 1.000000e+00 : f32
    %cst_8 = arith.constant 0.000000e+00 : f32
    %10 = vector.broadcast %cst_7 : f32 to vector<32x8xf32>
    %11 = vector.broadcast %cst_8 : f32 to vector<32x8xf32>
    %12 = arith.select %9, %10, %11 : vector<32x8xi1>, vector<32x8xf32>
    %cst_9 = arith.constant dense<0.000000e+00> : vector<32x96xf32>
    %13 = tpu.matmul %12, %4, %cst_9 {dimension_numbers = #tpu.dot_dimension_numbers<[1], [0], [0], [1], [0, 0, 1, 1], [], []>, precision = #tpu.contract_precision<fp32>} : vector<32x8xf32>, vector<8x96xf32>, vector<32x96xf32> -> vector<32x96xf32>
    %14 = tpu.iota {dimensions = array<i32: 0>} : vector<32x8xi32>
    %c3_i32 = arith.constant 3 : i32
    %15 = vector.broadcast %c3_i32 : i32 to vector<32x8xi32>
    %16 = arith.andi %14, %15 : vector<32x8xi32>
    %cst_10 = arith.constant 0.000000e+00 : f32
    %17 = vector.broadcast %cst_10 : f32 to vector<32x8xf32>
    %cst_11 = arith.constant 0.000000e+00 : f32
    %18 = vector.broadcast %cst_11 : f32 to vector<32x8xf32>
    %cst_12 = arith.constant 0.000000e+00 : f32
    %19 = vector.broadcast %cst_12 : f32 to vector<32x8xf32>
    %c0_i32 = arith.constant 0 : i32
    %20 = vector.broadcast %c0_i32 : i32 to vector<32x8xi32>
    %21 = arith.cmpi eq, %16, %20 : vector<32x8xi32>
    %22 = vector.extract_strided_slice %13 {offsets = [0, 0], sizes = [32, 8], strides = [1, 1]} : vector<32x96xf32> to vector<32x8xf32>
    %cst_13 = arith.constant 0.000000e+00 : f32
    %23 = vector.broadcast %cst_13 : f32 to vector<32x8xf32>
    %24 = arith.select %21, %22, %23 : vector<32x8xi1>, vector<32x8xf32>
    %25 = arith.addf %17, %24 : vector<32x8xf32>
    %26 = vector.extract_strided_slice %13 {offsets = [0, 32], sizes = [32, 8], strides = [1, 1]} : vector<32x96xf32> to vector<32x8xf32>
    %cst_14 = arith.constant 0.000000e+00 : f32
    %27 = vector.broadcast %cst_14 : f32 to vector<32x8xf32>
    %28 = arith.select %21, %26, %27 : vector<32x8xi1>, vector<32x8xf32>
    %29 = arith.addf %18, %28 : vector<32x8xf32>
    %30 = vector.extract_strided_slice %13 {offsets = [0, 64], sizes = [32, 8], strides = [1, 1]} : vector<32x96xf32> to vector<32x8xf32>
    %cst_15 = arith.constant 0.000000e+00 : f32
    %31 = vector.broadcast %cst_15 : f32 to vector<32x8xf32>
    %32 = arith.select %21, %30, %31 : vector<32x8xi1>, vector<32x8xf32>
    %33 = arith.addf %19, %32 : vector<32x8xf32>
    %c1_i32 = arith.constant 1 : i32
    %34 = vector.broadcast %c1_i32 : i32 to vector<32x8xi32>
    %35 = arith.cmpi eq, %16, %34 : vector<32x8xi32>
    %36 = vector.extract_strided_slice %13 {offsets = [0, 8], sizes = [32, 8], strides = [1, 1]} : vector<32x96xf32> to vector<32x8xf32>
    %cst_16 = arith.constant 0.000000e+00 : f32
    %37 = vector.broadcast %cst_16 : f32 to vector<32x8xf32>
    %38 = arith.select %35, %36, %37 : vector<32x8xi1>, vector<32x8xf32>
    %39 = arith.addf %25, %38 : vector<32x8xf32>
    %40 = vector.extract_strided_slice %13 {offsets = [0, 40], sizes = [32, 8], strides = [1, 1]} : vector<32x96xf32> to vector<32x8xf32>
    %cst_17 = arith.constant 0.000000e+00 : f32
    %41 = vector.broadcast %cst_17 : f32 to vector<32x8xf32>
    %42 = arith.select %35, %40, %41 : vector<32x8xi1>, vector<32x8xf32>
    %43 = arith.addf %29, %42 : vector<32x8xf32>
    %44 = vector.extract_strided_slice %13 {offsets = [0, 72], sizes = [32, 8], strides = [1, 1]} : vector<32x96xf32> to vector<32x8xf32>
    %cst_18 = arith.constant 0.000000e+00 : f32
    %45 = vector.broadcast %cst_18 : f32 to vector<32x8xf32>
    %46 = arith.select %35, %44, %45 : vector<32x8xi1>, vector<32x8xf32>
    %47 = arith.addf %33, %46 : vector<32x8xf32>
    %c2_i32_19 = arith.constant 2 : i32
    %48 = vector.broadcast %c2_i32_19 : i32 to vector<32x8xi32>
    %49 = arith.cmpi eq, %16, %48 : vector<32x8xi32>
    %50 = vector.extract_strided_slice %13 {offsets = [0, 16], sizes = [32, 8], strides = [1, 1]} : vector<32x96xf32> to vector<32x8xf32>
    %cst_20 = arith.constant 0.000000e+00 : f32
    %51 = vector.broadcast %cst_20 : f32 to vector<32x8xf32>
    %52 = arith.select %49, %50, %51 : vector<32x8xi1>, vector<32x8xf32>
    %53 = arith.addf %39, %52 : vector<32x8xf32>
    %54 = vector.extract_strided_slice %13 {offsets = [0, 48], sizes = [32, 8], strides = [1, 1]} : vector<32x96xf32> to vector<32x8xf32>
    %cst_21 = arith.constant 0.000000e+00 : f32
    %55 = vector.broadcast %cst_21 : f32 to vector<32x8xf32>
    %56 = arith.select %49, %54, %55 : vector<32x8xi1>, vector<32x8xf32>
    %57 = arith.addf %43, %56 : vector<32x8xf32>
    %58 = vector.extract_strided_slice %13 {offsets = [0, 80], sizes = [32, 8], strides = [1, 1]} : vector<32x96xf32> to vector<32x8xf32>
    %cst_22 = arith.constant 0.000000e+00 : f32
    %59 = vector.broadcast %cst_22 : f32 to vector<32x8xf32>
    %60 = arith.select %49, %58, %59 : vector<32x8xi1>, vector<32x8xf32>
    %61 = arith.addf %47, %60 : vector<32x8xf32>
    %c3_i32_23 = arith.constant 3 : i32
    %62 = vector.broadcast %c3_i32_23 : i32 to vector<32x8xi32>
    %63 = arith.cmpi eq, %16, %62 : vector<32x8xi32>
    %64 = vector.extract_strided_slice %13 {offsets = [0, 24], sizes = [32, 8], strides = [1, 1]} : vector<32x96xf32> to vector<32x8xf32>
    %cst_24 = arith.constant 0.000000e+00 : f32
    %65 = vector.broadcast %cst_24 : f32 to vector<32x8xf32>
    %66 = arith.select %63, %64, %65 : vector<32x8xi1>, vector<32x8xf32>
    %67 = arith.addf %53, %66 : vector<32x8xf32>
    %68 = vector.extract_strided_slice %13 {offsets = [0, 56], sizes = [32, 8], strides = [1, 1]} : vector<32x96xf32> to vector<32x8xf32>
    %cst_25 = arith.constant 0.000000e+00 : f32
    %69 = vector.broadcast %cst_25 : f32 to vector<32x8xf32>
    %70 = arith.select %63, %68, %69 : vector<32x8xi1>, vector<32x8xf32>
    %71 = arith.addf %57, %70 : vector<32x8xf32>
    %72 = vector.extract_strided_slice %13 {offsets = [0, 88], sizes = [32, 8], strides = [1, 1]} : vector<32x96xf32> to vector<32x8xf32>
    %cst_26 = arith.constant 0.000000e+00 : f32
    %73 = vector.broadcast %cst_26 : f32 to vector<32x8xf32>
    %74 = arith.select %63, %72, %73 : vector<32x8xi1>, vector<32x8xf32>
    %75 = arith.addf %61, %74 : vector<32x8xf32>
    %cst_27 = arith.constant dense<0.000000e+00> : vector<32x32xf32>
    %76 = tpu.matmul %67, %71, %cst_27 {dimension_numbers = #tpu.dot_dimension_numbers<[1], [1], [0], [0], [0, 0, 1, 0], [], []>, precision = #tpu.contract_precision<fp32>} : vector<32x8xf32>, vector<32x8xf32>, vector<32x32xf32> -> vector<32x32xf32>
    %77 = tpu.iota {dimensions = array<i32: 0>} : vector<32x32xi32>
    %c3_i32_28 = arith.constant 3 : i32
    %78 = vector.broadcast %c3_i32_28 : i32 to vector<32x32xi32>
    %79 = arith.shrsi %77, %78 : vector<32x32xi32>
    %80 = tpu.iota {dimensions = array<i32: 1>} : vector<32x32xi32>
    %c3_i32_29 = arith.constant 3 : i32
    %81 = vector.broadcast %c3_i32_29 : i32 to vector<32x32xi32>
    %82 = arith.shrsi %80, %81 : vector<32x32xi32>
    %83 = tpu.concatenate %1, %1, %1, %1 in 1 : vector<32x8xf32>, vector<32x8xf32>, vector<32x8xf32>, vector<32x8xf32> -> vector<32x32xf32>
    %cst_30 = arith.constant 0.353553385 : f32
    %84 = vector.broadcast %cst_30 : f32 to vector<32x32xf32>
    %85 = arith.mulf %76, %84 : vector<32x32xf32>
    %86 = arith.cmpi eq, %79, %82 : vector<32x32xi32>
    %cst_31 = arith.constant -1.000000e+30 : f32
    %87 = vector.broadcast %cst_31 : f32 to vector<32x32xf32>
    %88 = arith.select %86, %83, %87 : vector<32x32xi1>, vector<32x32xf32>
    %89 = arith.addf %85, %88 : vector<32x32xf32>
    %cst_32 = arith.constant dense<0xFF800000> : vector<32xf32>
    %90 = vector.multi_reduction <maximumf>, %89, %cst_32 [1] : vector<32x32xf32> to vector<32xf32>
    %91 = vector.shape_cast %90 : vector<32xf32> to vector<32x1xf32>
    %92 = vector.broadcast %91 : vector<32x1xf32> to vector<32x32xf32>
    %93 = arith.subf %89, %92 : vector<32x32xf32>
    %94 = math.exp %93 : vector<32x32xf32>
    %cst_33 = arith.constant dense<0.000000e+00> : vector<32xf32>
    %95 = vector.multi_reduction <add>, %94, %cst_33 [1] : vector<32x32xf32> to vector<32xf32>
    %96 = vector.shape_cast %95 : vector<32xf32> to vector<32x1xf32>
    %97 = vector.broadcast %96 : vector<32x1xf32> to vector<32x32xf32>
    %98 = arith.divf %94, %97 : vector<32x32xf32>
    %cst_34 = arith.constant dense<0.000000e+00> : vector<32x8xf32>
    %99 = tpu.matmul %98, %75, %cst_34 {dimension_numbers = #tpu.dot_dimension_numbers<[1], [0], [0], [1], [0, 0, 1, 1], [], []>, precision = #tpu.contract_precision<fp32>} : vector<32x32xf32>, vector<32x8xf32>, vector<32x8xf32> -> vector<32x8xf32>
    %100 = tpu.iota {dimensions = array<i32: 0>} : vector<32x32xi32>
    %c3_i32_35 = arith.constant 3 : i32
    %101 = vector.broadcast %c3_i32_35 : i32 to vector<32x32xi32>
    %102 = arith.shrsi %100, %101 : vector<32x32xi32>
    %103 = tpu.iota {dimensions = array<i32: 1>} : vector<32x32xi32>
    %c3_i32_36 = arith.constant 3 : i32
    %104 = vector.broadcast %c3_i32_36 : i32 to vector<32x32xi32>
    %105 = arith.shrsi %103, %104 : vector<32x32xi32>
    %106 = arith.cmpi eq, %102, %105 : vector<32x32xi32>
    %107 = tpu.concatenate %99, %99, %99, %99 in 1 : vector<32x8xf32>, vector<32x8xf32>, vector<32x8xf32>, vector<32x8xf32> -> vector<32x32xf32>
    %cst_37 = arith.constant 0.000000e+00 : f32
    %108 = vector.broadcast %cst_37 : f32 to vector<32x32xf32>
    %109 = arith.select %106, %107, %108 : vector<32x32xi1>, vector<32x32xf32>
    %cst_38 = arith.constant dense<0.000000e+00> : vector<32x32xf32>
    %110 = tpu.matmul %109, %3, %cst_38 {dimension_numbers = #tpu.dot_dimension_numbers<[1], [0], [0], [1], [0, 0, 1, 1], [], []>, precision = #tpu.contract_precision<fp32>} : vector<32x32xf32>, vector<32x32xf32>, vector<32x32xf32> -> vector<32x32xf32>
    %111 = vector.extract_strided_slice %110 {offsets = [0, 0], sizes = [8, 32], strides = [1, 1]} : vector<32x32xf32> to vector<8x32xf32>
    %112 = vector.extract_strided_slice %110 {offsets = [8, 0], sizes = [8, 32], strides = [1, 1]} : vector<32x32xf32> to vector<8x32xf32>
    %113 = arith.addf %111, %112 : vector<8x32xf32>
    %114 = vector.extract_strided_slice %110 {offsets = [16, 0], sizes = [8, 32], strides = [1, 1]} : vector<32x32xf32> to vector<8x32xf32>
    %115 = arith.addf %113, %114 : vector<8x32xf32>
    %116 = vector.extract_strided_slice %110 {offsets = [24, 0], sizes = [8, 32], strides = [1, 1]} : vector<32x32xf32> to vector<8x32xf32>
    %117 = arith.addf %115, %116 : vector<8x32xf32>
    %c0_39 = arith.constant 0 : index
    %c0_40 = arith.constant 0 : index
    %118 = vector.load %arg5[%c0_39, %c0_40] : memref<8x32xf32, #tpu.memory_space<vmem>>, vector<8x32xf32>
    tpu.vector_store %arg5[%c0_39, %c0_40], %117 {strides = array<i32>} : memref<8x32xf32, #tpu.memory_space<vmem>>, vector<8x32xf32>,
    return
  }
  func.func @transform_0(%arg0: i32) -> (i32, i32) {
    %c0_i32 = arith.constant 0 : i32
    %c0_i32_0 = arith.constant 0 : i32
    return %arg0, %c0_i32 : i32, i32
  }
  func.func @transform_1(%arg0: i32) -> (i32, i32) {
    %c0_i32 = arith.constant 0 : i32
    %c0_i32_0 = arith.constant 0 : i32
    return %arg0, %c0_i32 : i32, i32
  }
  func.func @transform_2(%arg0: i32) -> (i32, i32) {
    %c0_i32 = arith.constant 0 : i32
    %c0_i32_0 = arith.constant 0 : i32
    %c0_i32_1 = arith.constant 0 : i32
    return %c0_i32, %c0_i32_0 : i32, i32
  }
  func.func @transform_3(%arg0: i32) -> (i32, i32) {
    %c0_i32 = arith.constant 0 : i32
    %c0_i32_0 = arith.constant 0 : i32
    %c0_i32_1 = arith.constant 0 : i32
    return %c0_i32, %c0_i32_0 : i32, i32
  }
  func.func @transform_4(%arg0: i32) -> (i32, i32) {
    %c0_i32 = arith.constant 0 : i32
    %c0_i32_0 = arith.constant 0 : i32
    return %arg0, %c0_i32 : i32, i32
  }
}

</mosaic_0001>

<bundles_post_ra>
// kernel: multi_head_attention.1
= control target key start
LH: loop header
LB: loop body
LE: loop exit
PB: predicated region body
PF: predicated region fallthrough
CT: control target
= control target key end

     0   :  { %9 = vsyncpa [#allocation3], 0  ;;  %s2683_s0 = inlined_call_operand.vmem [shape: f32[16,32], index: 0, kind: input, shape index: {}]   ;;  %s2684_s1 = inlined_call_operand.vmem [shape: f32[64,8], index: 1, kind: input, shape index: {}]   ;;  %s2685_s2 = inlined_call_operand.vmem [shape: f32[32,96], index: 2, kind: input, shape index: {}]   ;;  %s2686_s3 = inlined_call_operand.vmem [shape: f32[32,32], index: 3, kind: input, shape index: {}]   ;;  %s2687_s4 = inlined_call_operand.hbm [shape: f32[16,32], index: 4, kind: output, shape index: {}]  }
   0x1   :  { %11 = vsyncpa [#allocation3 + $0x1], 0  ;;  %s2190_s15 = smov 0   ;;  %s2192_s16 = smov 0  }
   0x2   :  { %s2194_s17 = smov 0   ;;  %s2196_s18 = smov 0  }
   0x3 LB: > { %s2211_s19 = sadd.s32 4294967295, %s2154_s18   ;;  %s2004_s20 = sadd.s32 4294967294, %s2154_s18   ;;  %s2154_s18 = sphi %s2196_s18, %s2703_s18   ;;  %s2150_s17 = sphi %s2194_s17, %s2702_s17   ;;  %s2146_s16 = sphi %s2192_s16, %s2701_s16   ;;  %s2142_s15 = sphi %s2190_s15, %s2700_s15  }
   0x4   : > { %s2215_s21 = sadd.s32 1, %s2154_s18   ;;  %s118_s22 = sadd.s32 1, %s2150_s17 }
   0x5   : > { %s115_s23 = ssub.s32 %s2154_s18, %s2215_s21  ;;  %p128_p0 = scmp.ne.s32.totalorder %s2150_s17, %s2146_s16 }
   0x6   : > { %p116_p1 = scmp.eq.s32.totalorder %s115_s23, 0  ;;  %p129_p2 = scmp.eq.s32.totalorder %s2211_s19, 1 }
   0x7   : > { %p134_p3 = scmp.ne.s32.totalorder %s2146_s16, %s2142_s15  ;;  %p135_p4 = scmp.eq.s32.totalorder %s2004_s20, 1 }
   0x8   : > { %s2226_s24 = scalar_select %p116_p1, %s2150_s17, %s118_s22  }
   0x9   : > { %p2228_p5 = por %p129_p2, %p128_p0  ;;  %p2232_p6 = por %p135_p4, %p134_p3 }
   0xa   : > { %p2007_p7 = scmp.ge.s32.totalorder %s2154_s18, 1  ;;  %p175_p8 = scmp.lt.s32.totalorder %s2154_s18, 3 }
   0xc   : > { %p176_p9 = pnand %p2007_p7, %p175_p8 }
   0xd   : > { %p205_p10 = scmp.lt.s32.totalorder (!%p176_p9), %s2211_s19, 1  ;;  %s2157_s14 = smov (!%p176_p9), 120  }
   0xe   : > { %179 = sbr.rel (%p176_p9) target bundleno = 1587 (0x633), region = 36  ;;  %s2158_s20 = smov (!%p176_p9), 112  }
   0xf   : > { %s2159_s22 = smov (!%p176_p9), 104   ;;  %s2160_s23 = smov (!%p176_p9), 96  }
  0x10   : > { %s2010_s27 = sshll.u32 (!%p176_p9), %s2211_s19, 2  ;;  %s2161_s6 = smov (!%p176_p9), 8  }
  0x11   : > { %p210_p11 = scmp.lt.s32.totalorder (!%p176_p9), %s2010_s27, 7  ;;  %s2162_s7 = smov (!%p176_p9), 24  }
  0x12   : > { %s2163_s8 = smov (!%p176_p9), 16   ;;  %s2025_s29 = sshll.u32 (!%p176_p9), %s2211_s19, 3 }
  0x13   : > { %v223_v0 = vld [vmem:[%s2685_s2 + $0x18] sm:$0xff]  ;;  %v222_v1 = vld [vmem:[%s2685_s2 + $0x10] sm:$0xff]  ;;  %v221_v2 = vld [vmem:[%s2685_s2 + $0x8] sm:$0xff]  ;;  %s206_s9 = scalar_select %p205_p10, %s2211_s19, 1  ;;  %vm228_vm0 = vcmask 261120   ;;  %v417_v31 = vlaneseq  ;;  %v2156_v36 = vmov 0.0  }
  0x14   : > { %v244_v3 = vand.u32 4294901760, %v223_v0  ;;  %v246_v4 = vand.u32 4294901760, %v222_v1  ;;  %v248_v5 = vand.u32 4294901760, %v221_v2  ;;  %v220_v6 = vld [vmem:[%s2685_s2] sm:$0xff]  ;;  %vm436_vm2 = vcmask 64512   ;;  %s2705_s27 = smov (!%p210_p11, %s2010_s27), 7 }
  0x15   : > { %v250_v7 = vand.u32 4294901760, %v220_v6  ;;  %s2009_s10 = sshll.u32 %s206_s9, 3  ;;  %v2256_v32 = vshrl.u32 %v417_v31, 7  ;;  %v2258_v33 = vand.u32 127, %v417_v31  ;;  %s2011_s28 = sshll.u32 %s2705_s27, 3 }
  0x16   : > { %v274_v8 = vsub.f32 %v223_v0, %v244_v3  ;;  %v280_v9 = vsub.f32 %v222_v1, %v246_v4  ;;  %345 = vmatpush.msra.mxu3 %v244_v3  ;;  %245 = vmatpush.msra.mxu0 %v244_v3  ;;  %v286_v10 = vsub.f32 %v221_v2, %v248_v5  ;;  %s208_s13 = scalar_lea.vmem %s2683_s0, %s2009_s10  ;;  %s2389_s5 = scalar_lea.vmem %s2684_s1, %s2011_s28 }
  0x17   : > { %v292_v11 = vsub.f32 %v220_v6, %v250_v7  ;;  %v215_v15 = vld [vmem:[%s208_s13] sm:$0xff]  ;;  %v424_v34 = vshra.s32 %v2256_v32, 2  ;;  %v2263_v35 = vadd.s32 8, %v2256_v32  ;;  %v2272_v40 = vadd.s32 16, %v2256_v32  ;;  %s2164_s9 = smov 64   ;;  %s202_s27 = sand.u32 1, %s2146_s16  }
  0x18   : > { %316 = vmatpush.msra.mxu2 %v274_v8  ;;  %v275_v12 = vand.u32 4294901760, %v274_v8  ;;  %347 = vmatpush.msra.mxu3 %v246_v4  ;;  %v281_v13 = vand.u32 4294901760, %v280_v9  ;;  %v287_v14 = vand.u32 4294901760, %v286_v10  ;;  %v230_v19 = vsel %vm228_vm0, %v215_v15, 0  ;;  %s2008_s28 = sshll.u32 %s202_s27, 3  ;;  %s1918_s19 = scalar_lea.sflag [#allocation3], %s202_s27 }
  0x19   : > { %247 = vmatpush.msra.mxu0 %v246_v4  ;;  %v293_v16 = vand.u32 4294901760, %v292_v11  ;;  %v252_v21 = vand.u32 4294901760, %v230_v19  ;;  %vm428_vm1 = vcmp.eq.s32.totalorder %v424_v34, %v2258_v33  ;;  %v425_v38 = vshra.s32 %v2263_v35, 2 }
  0x1a   : > { %319 = vmatpush.msra.mxu2 %v280_v9  ;;  %v276_v17 = vsub.f32 %v274_v8, %v275_v12  ;;  %v282_v18 = vsub.f32 %v280_v9, %v281_v13  ;;  %349 = vmatpush.msra.mxu3 %v248_v5  ;;  %v288_v20 = vsub.f32 %v286_v10, %v287_v14  ;;  %v2265_v37 = vsel %vm428_vm1, 1.0, %v2156_v36 }
  0x1b   : > { %249 = vmatpush.msra.mxu0 %v248_v5  ;;  %v294_v24 = vsub.f32 %v292_v11, %v293_v16  ;;  %v253_v25 = vsub.f32 %v230_v19, %v252_v21  ;;  %v438_v39 = vsel %vm436_vm2, %v2265_v37, 0  ;;  %vm429_vm3 = vcmp.eq.s32.totalorder %v425_v38, %v2258_v33 }
  0x1c   : > { %v277_v22 = vand.u32 4294901760, %v276_v17  ;;  %322 = vmatpush.msra.mxu2 %v286_v10  ;;  %v283_v23 = vand.u32 4294901760, %v282_v18  ;;  %351 = vmatpush.msra.mxu3 %v250_v7  ;;  %v289_v26 = vand.u32 4294901760, %v288_v20  ;;  %v467_v43 = vsub.f32 %v438_v39, %v438_v39 }
  0x1d   : > { %251 = vmatpush.msra.mxu0 %v250_v7  ;;  %v254_v27 = vand.u32 4294901760, %v253_v25  ;;  %v295_v28 = vand.u32 4294901760, %v294_v24  ;;  %v2274_v46 = vsel %vm429_vm3, 1.0, %v2156_v36  ;;  %v426_v48 = vshra.s32 %v2272_v40, 2 }
  0x1e   : > { %278 = vmatpush.msra.mxu1 %v277_v22  ;;  %325 = vmatpush.msra.mxu2 %v292_v11  ;;  %v468_v50 = vand.u32 4294901760, %v467_v43  ;;  %v441_v51 = vsel %vm436_vm2, %v2274_v46, 0  ;;  %v2281_v53 = vadd.s32 24, %v2256_v32  ;;  %v2306_v34 = vand.u32 3, %v2256_v32 }
  0x1f   : > { %328 = vmatmul.f32.vlgmr.msra.gmra.mxu2 %v253_v25  ;;  %374 = vmatpush.msrb.mxu0 %v275_v12  ;;  %v255_v29 = vsub.f32 %v253_v25, %v254_v27  ;;  %vm430_vm4 = vcmp.eq.s32.totalorder %v426_v48, %v2258_v33  ;;  %v475_v57 = vsub.f32 %v441_v51, %v441_v51 }
  0x20   : > { %284 = vmatpush.msra.mxu1 %v283_v23  ;;  %355 = vmatmul.f32.vlgmr.msra.gmra.mxu3 %v254_v27  ;;  %v469_v56 = vsub.f32 %v467_v43, %v468_v50  ;;  %v434_v59 = vsel %vm430_vm4, 1.0, %v2156_v36  ;;  %v427_v61 = vshra.s32 %v2281_v53, 2  ;;  %vm692_vm6 = vcmp.eq.s32.totalorder %v2306_v34, 0 }
  0x21   : > { %378 = vmatpush.msrb.mxu0 %v281_v13  ;;  %v256_v30 = vand.u32 4294901760, %v255_v29  ;;  %v476_v63 = vand.u32 4294901760, %v475_v57  ;;  %v444_v1 = vsel %vm436_vm2, %v434_v59, 0  ;;  %vm704_vm12 = vcmp.eq.s32.totalorder %v2306_v34, 1 }
  0x22   : > { %290 = vmatpush.msra.mxu1 %v289_v26  ;;  %v470_v62 = vand.u32 4294901760, %v469_v56  ;;  %vm431_vm5 = vcmp.eq.s32.totalorder %v427_v61, %v2258_v33  ;;  %vm760_vm1 = vcmp.eq.s32.totalorder %v2306_v34, 3 }
  0x23   : > { %382 = vmatpush.msrb.mxu0 %v287_v14  ;;  %v435_v6 = vsel %vm431_vm5, 1.0, %v2156_v36  ;;  %vm732_vm5 = vcmp.eq.s32.totalorder %v2306_v34, 2 }
  0x24   : > { %296 = vmatpush.msra.mxu1 %v295_v28  ;;  %257 = vmatmul.f32.vlgmr.msra.gmra.mxu0 %v256_v30  ;;  %v447_v11 = vsel %vm436_vm2, %v435_v6, 0 }
  0x25   : > { %298 = vmatmul.f32.vlgmr.msra.gmra.mxu1 %v252_v21  ;;  %386 = vmatpush.msrb.mxu0 %v293_v16  ;;  %v491_v13 = vsub.f32 %v447_v11, %v447_v11 }
  0x26   : > { %405 = vmatpush.msrb.mxu1 %v244_v3  ;;  %v477_v3 = vsub.f32 %v475_v57, %v476_v63 }
  0x27   : > { %v492_v15 = vand.u32 4294901760, %v491_v13 }
  0x28   : > { %407 = vmatpush.msrb.mxu1 %v246_v4  ;;  %v483_v4 = vsub.f32 %v444_v1, %v444_v1  ;;  %v478_v8 = vand.u32 4294901760, %v477_v3 }
  0x29   : > { %v493_v16 = vsub.f32 %v491_v13, %v492_v15 }
  0x2a   : > { %409 = vmatpush.msrb.mxu1 %v248_v5  ;;  %v484_v9 = vand.u32 4294901760, %v483_v4 }
  0x2b   : > { %v494_v17 = vand.u32 4294901760, %v493_v16 }
  0x2c   : > { %411 = vmatpush.msrb.mxu1 %v250_v7  ;;  %388 = vmatmul.f32.vlgmr.msrb.gmra.mxu0 %v252_v21  ;;  %v485_v12 = vsub.f32 %v483_v4, %v484_v9 }
  0x2d   : > { %413 = vmatmul.f32.vlgmr.msrb.gmra.mxu1 %v252_v21 }
  0x2e   : > { %v486_v14 = vand.u32 4294901760, %v485_v12 }
  0xa1   : > { %v258_v41 = vpop.f32.mrf.mxu0 }
  0xa2   : > { %v299_v42 = vpop.f32.mrf.mxu1  ;;  %v329_v45 = vpop.f32.mrf.mxu2 }
  0xa3   : > { %v300_v44 = vadd.f32 %v299_v42, %v258_v41  ;;  %v356_v49 = vpop.f32.mrf.mxu3 }
  0xa5   : > { %v330_v47 = vadd.f32 %v329_v45, %v300_v44 }
  0xa7   : > { %v357_v52 = vadd.f32 %v356_v49, %v330_v47  ;;  %v2315_v47 = vand.u32 3, %v2263_v35 }
  0xa9   : > { %v389_v54 = vpop.f32.mrf.mxu0  ;;  %vm705_vm7 = vcmp.eq.s32.totalorder %v2315_v47, 1  ;;  %vm693_vm8 = vcmp.eq.s32.totalorder %v2315_v47, 0  ;;  %vm733_vm3 = vcmp.eq.s32.totalorder %v2315_v47, 2 }
  0xaa   : > { %v414_v55 = vpop.f32.mrf.mxu1  ;;  %v390_v58 = vadd.f32 %v389_v54, %v357_v52 }
  0xac   : > { %v415_v60 = vadd.f32 %v414_v55, %v390_v58 }
  0xae   : > { %v464_v0 = vand.u32 4294901760, %v415_v60 }
  0xb0   : > { %v515_v2 = vsub.f32 %v415_v60, %v464_v0  ;;  %465 = vmatpush.msrb.mxu2 %v464_v0  ;;  %592 = vmatpush.msra.mxu1 %v464_v0 }
  0xb1   : > { %471 = vmatmul.f32.vlgmr.msrb.gmra.mxu2 %v470_v62  ;;  %596 = vmatmul.f32.vlgmr.msra.gmra.mxu1 %v468_v50 }
  0xb2   : > { %554 = vmatpush.msra.mxu0 %v515_v2  ;;  %v516_v5 = vand.u32 4294901760, %v515_v2 }
  0xb3   : > { %557 = vmatmul.f32.vlgmr.msra.gmra.mxu0 %v467_v43 }
  0xb4   : > { %636 = vmatpush.msra.mxu2 %v516_v5  ;;  %v517_v7 = vsub.f32 %v515_v2, %v516_v5 }
  0xb6   : > { %v518_v10 = vand.u32 4294901760, %v517_v7 }
  0xb8   : > { %519 = vmatpush.msrb.mxu3 %v518_v10 }
  0xb9   : > { %479 = vmatmul.f32.gmra.mxu2 %v478_v8  ;;  %2012 = vmatmul.msk.f32.vlgmr.msrb.gmra.mxu3 %vm436_vm2, %v2265_v37  ;;  %v691_v8 = vand.u32 3, %v2281_v53 }
  0xba   : > { %670 = vmatpush.msra.mxu3 %v464_v0  ;;  %602 = vmatmul.f32.gmra.mxu1 %v476_v63 }
  0xbb   : > { %562 = vmatmul.f32.gmra.mxu0 %v475_v57  ;;  %vm763_vm13 = vcmp.eq.s32.totalorder %v691_v8, 3  ;;  %vm707_vm14 = vcmp.eq.s32.totalorder %v691_v8, 1  ;;  %vm695_vm15 = vcmp.eq.s32.totalorder %v691_v8, 0  ;;  %vm735_vm4 = vcmp.eq.s32.totalorder %v691_v8, 2 }
  0xc1   : > { %487 = vmatmul.f32.gmra.mxu2 %v486_v14  ;;  %2013 = vmatmul.msk.f32.gmra.mxu3 %vm436_vm2, %v2274_v46 }
  0xc2   : > { %608 = vmatmul.f32.gmra.mxu1 %v484_v9 }
  0xc3   : > { %567 = vmatmul.f32.gmra.mxu0 %v483_v4 }
  0xc9   : > { %495 = vmatmul.f32.gmra.mxu2 %v494_v17  ;;  %2014 = vmatmul.msk.f32.gmra.mxu3 %vm436_vm2, %v434_v59 }
  0xca   : > { %614 = vmatmul.f32.gmra.mxu1 %v492_v15 }
  0xcb   : > { %572 = vmatmul.f32.gmra.mxu0 %v491_v13 }
  0xd1   : > { %2015 = vmatmul.msk.f32.gmra.mxu3 %vm436_vm2, %v435_v6  ;;  %2016 = vmatmul.msk.f32.vlgmr.msra.gmra.mxu2 %vm436_vm2, %v2265_v37 }
  0xd9   : > { %2017 = vmatmul.msk.f32.gmra.mxu2 %vm436_vm2, %v2274_v46  ;;  %2020 = vmatmul.msk.f32.vlgmr.msra.gmra.mxu3 %vm436_vm2, %v2265_v37 }
  0xe1   : > { %2018 = vmatmul.msk.f32.gmra.mxu2 %vm436_vm2, %v434_v59  ;;  %2021 = vmatmul.msk.f32.gmra.mxu3 %vm436_vm2, %v2274_v46 }
  0xe9   : > { %2019 = vmatmul.msk.f32.gmra.mxu2 %vm436_vm2, %v435_v6  ;;  %2022 = vmatmul.msk.f32.gmra.mxu3 %vm436_vm2, %v434_v59  ;;  %v690_v59 = vand.u32 3, %v2272_v40 }
  0xeb   : > { %vm706_vm9 = vcmp.eq.s32.totalorder %v690_v59, 1  ;;  %vm734_vm10 = vcmp.eq.s32.totalorder %v690_v59, 2  ;;  %vm694_vm11 = vcmp.eq.s32.totalorder %v690_v59, 0 }
  0xf1   : > { %2023 = vmatmul.msk.f32.gmra.mxu3 %vm436_vm2, %v435_v6 }
 0x12e   : > { %v597_v26 = vpop.f32.mrf.mxu1 }
 0x130   : > { %v558_v23 = vpop.f32.mrf.mxu0 }
 0x134   : > { %v472_v18 = vpop.f32.mrf.mxu2 }
 0x137   : > { %v603_v38 = vpop.f32.mrf.mxu1 }
 0x138   : > { %v563_v31 = vpop.f32.mrf.mxu0 }
 0x13c   : > { %v480_v19 = vpop.f32.mrf.mxu2  ;;  %v522_v20 = vpop.f32.mrf.mxu3 }
 0x13d   : > { %v523_v27 = vadd.f32 %v522_v20, %v472_v18 }
 0x13f   : > { %v559_v30 = vadd.f32 %v558_v23, %v523_v27  ;;  %v609_v51 = vpop.f32.mrf.mxu1 }
 0x140   : > { %v568_v46 = vpop.f32.mrf.mxu0 }
 0x141   : > { %v598_v36 = vadd.f32 %v597_v26, %v559_v30 }
 0x144   : > { %v488_v21 = vpop.f32.mrf.mxu2  ;;  %v526_v22 = vpop.f32.mrf.mxu3 }
 0x145   : > { %v527_v37 = vadd.f32 %v526_v22, %v480_v19 }
 0x147   : > { %v564_v43 = vadd.f32 %v563_v31, %v527_v37  ;;  %v615_v3 = vpop.f32.mrf.mxu1 }
 0x148   : > { %v573_v62 = vpop.f32.mrf.mxu0 }
 0x149   : > { %v604_v48 = vadd.f32 %v603_v38, %v564_v43 }
 0x14c   : > { %v496_v24 = vpop.f32.mrf.mxu2  ;;  %v530_v25 = vpop.f32.mrf.mxu3 }
 0x14d   : > { %v531_v49 = vadd.f32 %v530_v25, %v488_v21 }
 0x14f   : > { %v569_v54 = vadd.f32 %v568_v46, %v531_v49 }
 0x151   : > { %v610_v60 = vadd.f32 %v609_v51, %v569_v54 }
 0x154   : > { %v534_v28 = vpop.f32.mrf.mxu3  ;;  %v639_v29 = vpop.f32.mrf.mxu2 }
 0x155   : > { %v640_v39 = vadd.f32 %v639_v29, %v598_v36  ;;  %v535_v61 = vadd.f32 %v534_v28, %v496_v24 }
 0x157   : > { %v574_v1 = vadd.f32 %v573_v62, %v535_v61 }
 0x159   : > { %v616_v9 = vadd.f32 %v615_v3, %v574_v1 }
 0x15c   : > { %v643_v41 = vpop.f32.mrf.mxu2  ;;  %v673_v42 = vpop.f32.mrf.mxu3 }
 0x15d   : > { %v2309_v44 = vadd.f32 %v673_v42, %v640_v39  ;;  %v644_v50 = vadd.f32 %v643_v41, %v604_v48 }
 0x15f   : > { %v2312_v45 = vsel %vm692_vm6, %v2309_v44, 0.0  ;;  %v708_v13 = vsel %vm704_vm12, %v2309_v44, 0.0  ;;  %v764_v17 = vsel %vm760_vm1, %v2309_v44, 0.0  ;;  %vm762_vm6 = vcmp.eq.s32.totalorder %v690_v59, 3 }
 0x160   : > { %v736_v20 = vsel %vm732_vm5, %v2309_v44, 0.0 }
 0x164   : > { %v677_v52 = vpop.f32.mrf.mxu3  ;;  %v647_v56 = vpop.f32.mrf.mxu2 }
 0x165   : > { %v678_v55 = vadd.f32 %v677_v52, %v644_v50  ;;  %v648_v63 = vadd.f32 %v647_v56, %v610_v60 }
 0x167   : > { %v709_v57 = vsel %vm705_vm7, %v678_v55, 0.0  ;;  %v2319_v58 = vsel %vm693_vm8, %v678_v55, 0.0  ;;  %v737_v18 = vsel %vm733_vm3, %v678_v55, 0.0  ;;  %vm761_vm7 = vcmp.eq.s32.totalorder %v2315_v47, 3 }
 0x168   : > { %718 = vrot.lane.b32.xlu2 %v709_v57, %s2157_s14  ;;  %v765_v22 = vsel %vm761_vm7, %v678_v55, 0.0  ;;  %vm1143_vm8 = vcmask 130048  }
 0x16c   : > { %v681_v0 = vpop.f32.mrf.mxu3  ;;  %v651_v7 = vpop.f32.mrf.mxu2 }
 0x16d   : > { %v682_v2 = vadd.f32 %v681_v0, %v648_v63  ;;  %v652_v10 = vadd.f32 %v651_v7, %v616_v9 }
 0x16f   : > { %v710_v4 = vsel %vm706_vm9, %v682_v2, 0.0  ;;  %v738_v5 = vsel %vm734_vm10, %v682_v2, 0.0  ;;  %v698_v6 = vsel %vm694_vm11, %v682_v2, 0.0  ;;  %v766_v21 = vsel %vm762_vm6, %v682_v2, 0.0 }
 0x170   : > { %720 = vrot.lane.b32.xlu1 %v710_v4, %s2157_s14  ;;  %748 = vrot.lane.b32.xlu2 %v738_v5, %s2158_s20  ;;  %vm1148_vm9 = vcmask 195584  }
 0x174   : > { %v685_v11 = vpop.f32.mrf.mxu3 }
 0x175   : > { %v686_v12 = vadd.f32 %v685_v11, %v652_v10 }
 0x177   : > { %v767_v14 = vsel %vm763_vm13, %v686_v12, 0.0  ;;  %v711_v15 = vsel %vm707_vm14, %v686_v12, 0.0  ;;  %v699_v16 = vsel %vm695_vm15, %v686_v12, 0.0  ;;  %v739_v19 = vsel %vm735_vm4, %v686_v12, 0.0 }
 0x178   : > { %716 = vrot.lane.b32.xlu2 %v708_v13, %s2157_s14  ;;  %778 = vrot.lane.b32.xlu1 %v767_v14, %s2159_s22 }
 0x179   : > { %722 = vrot.lane.b32.xlu0 %v711_v15, %s2157_s14  ;;  %s2112_s14 = scalar_lea.hbm %s2687_s4, 16 }
 0x180   : > { %772 = vrot.lane.b32.xlu2 %v764_v17, %s2159_s22  ;;  %746 = vrot.lane.b32.xlu1 %v737_v18, %s2158_s20 }
 0x181   : > { %750 = vrot.lane.b32.xlu0 %v739_v19, %s2158_s20 }
 0x188   : > { %744 = vrot.lane.b32.xlu1 %v736_v20, %s2158_s20 }
 0x189   : > { %776 = vrot.lane.b32.xlu0 %v766_v21, %s2159_s22 }
 0x191   : > { %774 = vrot.lane.b32.xlu0 %v765_v22, %s2159_s22 }
 0x1c2   : > { %v719_v23 = vpop.permute.xlu2 %718 }
 0x1c3   : > { %v729_v48 = vadd.f32 %v719_v23, %v2319_v58 }
 0x1ca   : > { %v749_v25 = vpop.permute.xlu2 %748 }
 0x1d2   : > { %v717_v28 = vpop.permute.xlu2 %716 }
 0x1d3   : > { %v728_v38 = vadd.f32 %v717_v28, %v2312_v45 }
 0x1da   : > { %v773_v44 = vpop.permute.xlu2 %772 }
 0x1e2   : > { %v721_v24 = vpop.permute.xlu1 %720 }
 0x1e3   : > { %v730_v36 = vadd.f32 %v721_v24, %v698_v6 }
 0x1e5   : > { %v758_v41 = vadd.f32 %v749_v25, %v730_v36 }
 0x1ea   : > { %v779_v26 = vpop.permute.xlu1 %778 }
 0x1eb   : > { %v723_v27 = vpop.permute.xlu0 %722 }
 0x1ec   : > { %v731_v29 = vadd.f32 %v723_v27, %v699_v16 }
 0x1f2   : > { %v747_v30 = vpop.permute.xlu1 %746 }
 0x1f3   : > { %v751_v31 = vpop.permute.xlu0 %750  ;;  %v757_v49 = vadd.f32 %v747_v30, %v729_v48 }
 0x1f4   : > { %v759_v34 = vadd.f32 %v751_v31, %v731_v29 }
 0x1f6   : > { %v2339_v37 = vadd.f32 %v779_v26, %v759_v34 }
 0x1f8   : > { %798 = vrot.lane.b32.xlu0 %v2339_v37, %s2160_s23  ;;  %v806_v29 = vsel %vm436_vm2, %v2339_v37, 0 }
 0x1f9   : > { %v860_v31 = vand.u32 4294901760, %v806_v29 }
 0x1fa   : > { %v745_v39 = vpop.permute.xlu1 %744 }
 0x1fb   : > { %v756_v42 = vadd.f32 %v745_v39, %v728_v38  ;;  %v777_v43 = vpop.permute.xlu0 %776  ;;  %v861_v39 = vsub.f32 %v806_v29, %v860_v31 }
 0x1fc   : > { %v2343_v46 = vadd.f32 %v777_v43, %v758_v41  ;;  %v216_v43 = vld [vmem:[%s2389_s5] sm:$0xff] }
 0x1fd   : > { %v2345_v47 = vadd.f32 %v773_v44, %v756_v42  ;;  %v862_v42 = vand.u32 4294901760, %v861_v39 }
 0x1fe   : > { %796 = vrot.lane.b32.xlu1 %v2343_v46, %s2160_s23  ;;  %v804_v18 = vsel %vm436_vm2, %v2343_v46, 0 }
 0x1ff   : > { %v800_v52 = vsel %vm436_vm2, %v2345_v47, 0  ;;  %v2378_v22 = vand.u32 4294901760, %v804_v18  ;;  %v863_v44 = vsub.f32 %v861_v39, %v862_v42 }
 0x200   : > { %792 = vrot.lane.b32.xlu0 %v2345_v47, %s2160_s23  ;;  %v2357_v59 = vand.u32 4294901760, %v800_v52 }
 0x201   : > { %v853_v27 = vsub.f32 %v804_v18, %v2378_v22  ;;  %v864_v48 = vand.u32 4294901760, %v863_v44 }
 0x202   : > { %v837_v63 = vsub.f32 %v800_v52, %v2357_v59 }
 0x203   : > { %v775_v50 = vpop.permute.xlu0 %774  ;;  %v854_v36 = vand.u32 4294901760, %v853_v27 }
 0x204   : > { %v2350_v51 = vadd.f32 %v775_v50, %v757_v49  ;;  %v838_v11 = vand.u32 4294901760, %v837_v63  ;;  %v217_v49 = vld [vmem:[%s2389_s5 + $0x8] sm:$0xff]  ;;  %v2405_v50 = vld [vmem:[%s2389_s5 + $0x10] sm:$0xff] }
 0x205   : > { %v855_v38 = vsub.f32 %v853_v27, %v854_v36 }
 0x206   : > { %794 = vrot.lane.b32.xlu2 %v2350_v51, %s2160_s23  ;;  %v802_v1 = vsel %vm436_vm2, %v2350_v51, 0  ;;  %v839_v17 = vsub.f32 %v837_v63, %v838_v11  ;;  %1103 = vrot.lane.b32.xlu1 %v216_v43, %s2161_s6 }
 0x207   : > { %v2369_v10 = vand.u32 4294901760, %v802_v1  ;;  %v856_v41 = vand.u32 4294901760, %v855_v38 }
 0x208   : > { %v840_v23 = vand.u32 4294901760, %v839_v17  ;;  %1127 = vrot.lane.b32.xlu0 %v216_v43, %s2162_s7 }
 0x209   : > { %v845_v16 = vsub.f32 %v802_v1, %v2369_v10 }
 0x20b   : > { %v846_v24 = vand.u32 4294901760, %v845_v16 }
 0x20d   : > { %v847_v28 = vsub.f32 %v845_v16, %v846_v24 }
 0x20e   : > { %1115 = vrot.lane.b32.xlu2 %v216_v43, %s2163_s8  ;;  %1105 = vrot.lane.b32.xlu1 %v217_v49, %s2161_s6 }
 0x20f   : > { %v848_v34 = vand.u32 4294901760, %v847_v28 }
 0x210   : > { %1129 = vrot.lane.b32.xlu0 %v217_v49, %s2162_s7 }
 0x216   : > { %1117 = vrot.lane.b32.xlu2 %v217_v49, %s2163_s8  ;;  %1107 = vrot.lane.b32.xlu1 %v2405_v50, %s2161_s6 }
 0x218   : > { %1131 = vrot.lane.b32.xlu0 %v2405_v50, %s2162_s7 }
 0x21e   : > { %1119 = vrot.lane.b32.xlu2 %v2405_v50, %s2163_s8 }
 0x260   : > { %v795_v45 = vpop.permute.xlu2 %794 }
 0x261   : > { %v810_v55 = vsel %vm436_vm2, %v795_v45, 0  ;;  %v2414_v45 = vld [vmem:[%s2389_s5 + $0x18] sm:$0xff] }
 0x262   : > { %v2359_v58 = vand.u32 4294901760, %v810_v55  ;;  %1109 = vrot.lane.b32.xlu1 %v2414_v45, %s2161_s6  ;;  %1133 = vrot.lane.b32.xlu0 %v2414_v45, %s2162_s7 }
 0x263   : > { %1121 = vrot.lane.b32.xlu2 %v2414_v45, %s2163_s8 }
 0x264   : > { %v894_v2 = vsub.f32 %v810_v55, %v2359_v58 }
 0x266   : > { %v895_v12 = vand.u32 4294901760, %v894_v2 }
 0x268   : > { %v896_v21 = vsub.f32 %v894_v2, %v895_v12 }
 0x26a   : > { %v799_v54 = vpop.permute.xlu0 %798  ;;  %v897_v25 = vand.u32 4294901760, %v896_v21 }
 0x26b   : > { %v814_v56 = vsel %vm436_vm2, %v799_v54, 0 }
 0x26c   : > { %v828_v57 = vand.u32 4294901760, %v814_v56 }
 0x26e   : > { %v882_v60 = vsub.f32 %v814_v56, %v828_v57  ;;  %829 = vmatpush.xpose.msrb.mxu0 %v828_v57  ;;  %980 = vmatpush.xpose.msrb.mxu3 %v828_v57 }
 0x270   : > { %v883_v61 = vand.u32 4294901760, %v882_v60  ;;  %v797_v62 = vpop.permute.xlu1 %796  ;;  %936 = vmatpush.xpose.msrb.mxu2 %v882_v60 }
 0x271   : > { %v812_v0 = vsel %vm436_vm2, %v797_v62, 0  ;;  %v1116_v62 = vpop.permute.xlu2 %1115 }
 0x272   : > { %v884_v3 = vsub.f32 %v882_v60, %v883_v61  ;;  %v830_v4 = vand.u32 4294901760, %v812_v0  ;;  %v793_v5 = vpop.permute.xlu0 %792 }
 0x273   : > { %v808_v6 = vsel %vm436_vm2, %v793_v5, 0 }
 0x274   : > { %v885_v7 = vand.u32 4294901760, %v884_v3  ;;  %v888_v8 = vsub.f32 %v812_v0, %v830_v4  ;;  %v2367_v9 = vand.u32 4294901760, %v808_v6  ;;  %831 = vmatpush.xpose.msrb.mxu0 %v830_v4  ;;  %982 = vmatpush.xpose.msrb.mxu3 %v830_v4 }
 0x276   : > { %v889_v13 = vand.u32 4294901760, %v888_v8  ;;  %v900_v14 = vsub.f32 %v808_v6, %v2367_v9  ;;  %886 = vmatpush.xpose.msrb.mxu1 %v885_v7  ;;  %939 = vmatpush.xpose.msrb.mxu2 %v888_v8  ;;  %v1094_v7 = vshra.s32 %v2256_v32, 3 }
 0x278   : > { %833 = vmatpush.xpose.msrb.mxu0 %v2359_v58  ;;  %984 = vmatpush.xpose.msrb.mxu3 %v2359_v58  ;;  %v890_v15 = vsub.f32 %v888_v8, %v889_v13  ;;  %v901_v19 = vand.u32 4294901760, %v900_v14  ;;  %v2430_v8 = vshra.s32 %v2258_v33, 3 }
 0x27a   : > { %942 = vmatpush.xpose.msrb.mxu2 %v894_v2  ;;  %v891_v20 = vand.u32 4294901760, %v890_v15  ;;  %v902_v26 = vsub.f32 %v900_v14, %v901_v19  ;;  %v1128_v1 = vpop.permute.xlu0 %1127  ;;  %vm2434_vm10 = vcmp.eq.s32.totalorder %v1094_v7, %v2430_v8 }
 0x27c   : > { %835 = vmatpush.xpose.msrb.mxu0 %v2367_v9  ;;  %892 = vmatpush.xpose.msrb.mxu1 %v891_v20  ;;  %v903_v30 = vand.u32 4294901760, %v902_v26 }
 0x27d   : > { %986 = vmatpush.xpose.msrb.mxu3 %v2367_v9 }
 0x27e   : > { %945 = vmatpush.xpose.msrb.mxu2 %v900_v14 }
 0x27f   : > { %841 = vmatmul.f32.vlgmr.msrb.gmra.mxu0 %v840_v23 }
 0x280   : > { %1027 = vmatpush.xpose.msra.mxu0 %v883_v61  ;;  %990 = vmatmul.f32.vlgmr.msrb.gmra.mxu3 %v838_v11 }
 0x281   : > { %898 = vmatpush.xpose.msrb.mxu1 %v897_v25  ;;  %948 = vmatmul.f32.vlgmr.msrb.gmra.mxu2 %v837_v63 }
 0x282   : > { %v1130_v32 = vpop.permute.xlu0 %1129 }
 0x284   : > { %1031 = vmatpush.xpose.msra.mxu0 %v889_v13  ;;  %v1118_v13 = vpop.permute.xlu2 %1117 }
 0x285   : > { %904 = vmatpush.xpose.msrb.mxu1 %v903_v30 }
 0x287   : > { %849 = vmatmul.f32.gmra.mxu0 %v848_v34 }
 0x288   : > { %1035 = vmatpush.xpose.msra.mxu0 %v895_v12  ;;  %906 = vmatmul.f32.vlgmr.msrb.gmra.mxu1 %v2357_v59 }
 0x289   : > { %1070 = vmatpush.xpose.msra.mxu1 %v828_v57  ;;  %996 = vmatmul.f32.gmra.mxu3 %v846_v24  ;;  %v1095_v24 = vshra.s32 %v2263_v35, 3 }
 0x28a   : > { %953 = vmatmul.f32.gmra.mxu2 %v845_v16 }
 0x28b   : > { %vm2446_vm11 = vcmp.eq.s32.totalorder %v1095_v24, %v2430_v8 }
 0x28c   : > { %1039 = vmatpush.xpose.msra.mxu0 %v901_v19 }
 0x28d   : > { %1072 = vmatpush.xpose.msra.mxu1 %v830_v4 }
 0x28f   : > { %857 = vmatmul.f32.gmra.mxu0 %v856_v41 }
 0x290   : > { %910 = vmatmul.f32.gmra.mxu1 %v2369_v10 }
 0x291   : > { %1074 = vmatpush.xpose.msra.mxu1 %v2359_v58  ;;  %1002 = vmatmul.f32.gmra.mxu3 %v854_v36 }
 0x292   : > { %958 = vmatmul.f32.gmra.mxu2 %v853_v27 }
 0x295   : > { %1076 = vmatpush.xpose.msra.mxu1 %v2367_v9 }
 0x297   : > { %865 = vmatmul.f32.gmra.mxu0 %v864_v48 }
 0x298   : > { %914 = vmatmul.f32.gmra.mxu1 %v2378_v22 }
 0x299   : > { %1008 = vmatmul.f32.gmra.mxu3 %v862_v42 }
 0x29a   : > { %963 = vmatmul.f32.gmra.mxu2 %v861_v39  ;;  %v1120_v39 = vpop.permute.xlu2 %1119 }
 0x29f   : > { %1041 = vmatmul.f32.vlgmr.msra.gmra.mxu0 %v2357_v59 }
 0x2a0   : > { %918 = vmatmul.f32.gmra.mxu1 %v860_v31 }
 0x2a7   : > { %1045 = vmatmul.f32.gmra.mxu0 %v2369_v10 }
 0x2a8   : > { %1078 = vmatmul.f32.vlgmr.msra.gmra.mxu1 %v2357_v59  ;;  %v1104_v59 = vpop.permute.xlu1 %1103 }
 0x2a9   : > { %v1139_v5 = vsel %vm436_vm2, %v216_v43, %v1104_v59 }
 0x2af   : > { %1049 = vmatmul.f32.gmra.mxu0 %v2378_v22 }
 0x2b0   : > { %1082 = vmatmul.f32.gmra.mxu1 %v2369_v10  ;;  %v1106_v6 = vpop.permute.xlu1 %1105  ;;  %v1144_v10 = vsel %vm1143_vm8, %v1139_v5, %v1116_v62 }
 0x2b1   : > { %v1149_v17 = vsel %vm1148_vm9, %v1144_v10, %v1128_v1  ;;  %v1140_v21 = vsel %vm436_vm2, %v217_v49, %v1106_v6 }
 0x2b2   : > { %v1145_v25 = vsel %vm1143_vm8, %v1140_v21, %v1118_v13 }
 0x2b3   : > { %v1150_v38 = vsel %vm1148_vm9, %v1145_v25, %v1130_v32 }
 0x2b4   : > { %v1162_v49 = vsel %vm2446_vm11, %v1150_v38, -1e+30 }
 0x2b7   : > { %1053 = vmatmul.f32.gmra.mxu0 %v860_v31 }
 0x2b8   : > { %1086 = vmatmul.f32.gmra.mxu1 %v2378_v22  ;;  %v1161_v22 = vsel %vm2434_vm10, %v1149_v17, -1e+30  ;;  %v1108_v26 = vpop.permute.xlu1 %1107 }
 0x2b9   : > { %v1141_v44 = vsel %vm436_vm2, %v2405_v50, %v1108_v26 }
 0x2c0   : > { %1090 = vmatmul.f32.gmra.mxu1 %v860_v31 }
 0x2fc   : > { %v842_v52 = vpop.f32.mrf.mxu0 }
 0x303   : > { %v991_v63 = vpop.f32.mrf.mxu3 }
 0x304   : > { %v850_v54 = vpop.f32.mrf.mxu0  ;;  %v949_v61 = vpop.f32.mrf.mxu2 }
 0x305   : > { %v907_v55 = vpop.f32.mrf.mxu1 }
 0x306   : > { %v908_v0 = vadd.f32 %v907_v55, %v842_v52  ;;  %v1132_v52 = vpop.permute.xlu0 %1131  ;;  %v1096_v55 = vshra.s32 %v2272_v40, 3 }
 0x308   : > { %v950_v4 = vadd.f32 %v949_v61, %v908_v0  ;;  %v1110_v61 = vpop.permute.xlu1 %1109  ;;  %vm2459_vm12 = vcmp.eq.s32.totalorder %v1096_v55, %v2430_v8 }
 0x30a   : > { %v992_v12 = vadd.f32 %v991_v63, %v950_v4 }
 0x30c   : > { %v858_v56 = vpop.f32.mrf.mxu0  ;;  %v997_v14 = vpop.f32.mrf.mxu3 }
 0x30d   : > { %v911_v57 = vpop.f32.mrf.mxu1  ;;  %v954_v9 = vpop.f32.mrf.mxu2 }
 0x30e   : > { %v912_v11 = vadd.f32 %v911_v57, %v850_v54 }
 0x310   : > { %v955_v19 = vadd.f32 %v954_v9, %v912_v11  ;;  %v1097_v9 = vshra.s32 %v2281_v53, 3 }
 0x312   : > { %v998_v28 = vadd.f32 %v997_v14, %v955_v19  ;;  %vm2472_vm13 = vcmp.eq.s32.totalorder %v1097_v9, %v2430_v8 }
 0x314   : > { %v866_v58 = vpop.f32.mrf.mxu0  ;;  %v1003_v35 = vpop.f32.mrf.mxu3 }
 0x315   : > { %v915_v60 = vpop.f32.mrf.mxu1  ;;  %v959_v30 = vpop.f32.mrf.mxu2 }
 0x316   : > { %v916_v27 = vadd.f32 %v915_v60, %v858_v56  ;;  %v1146_v56 = vsel %vm1143_vm8, %v1141_v44, %v1120_v39 }
 0x317   : > { %v1151_v0 = vsel %vm1148_vm9, %v1146_v56, %v1132_v52 }
 0x318   : > { %v960_v42 = vadd.f32 %v959_v30, %v916_v27  ;;  %v1163_v5 = vsel %vm2459_vm12, %v1151_v0, -1e+30 }
 0x31a   : > { %v1004_v59 = vadd.f32 %v1003_v35, %v960_v42 }
 0x31c   : > { %v1042_v3 = vpop.f32.mrf.mxu0  ;;  %v1009_v6 = vpop.f32.mrf.mxu3 }
 0x31d   : > { %v919_v2 = vpop.f32.mrf.mxu1  ;;  %v1043_v15 = vadd.f32 %v1042_v3, %v992_v12  ;;  %v964_v1 = vpop.f32.mrf.mxu2 }
 0x31e   : > { %v920_v57 = vadd.f32 %v919_v2, %v866_v58  ;;  %v1142_v58 = vsel %vm436_vm2, %v2414_v45, %v1110_v61  ;;  %v1122_v2 = vpop.permute.xlu2 %1121  ;;  %v1134_v12 = vpop.permute.xlu0 %1133 }
 0x31f   : > { %v1147_v11 = vsel %vm1143_vm8, %v1142_v58, %v1122_v2 }
 0x320   : > { %v965_v40 = vadd.f32 %v964_v1, %v920_v57  ;;  %v1152_v32 = vsel %vm1148_vm9, %v1147_v11, %v1134_v12 }
 0x321   : > { %v1164_v53 = vsel %vm2472_vm13, %v1152_v32, -1e+30 }
 0x322   : > { %v1010_v13 = vadd.f32 %v1009_v6, %v965_v40 }
 0x324   : > { %v1046_v18 = vpop.f32.mrf.mxu0 }
 0x325   : > { %v1079_v33 = vpop.f32.mrf.mxu1  ;;  %v1047_v31 = vadd.f32 %v1046_v18, %v998_v28 }
 0x326   : > { %v1080_v20 = vadd.f32 %v1079_v33, %v1043_v15 }
 0x328   : > { %v1153_v23 = vmul.f32 0.35355338, %v1080_v20 }
 0x32a   : > { %v1165_v29 = vadd.f32 %v1161_v22, %v1153_v23 }
 0x32c   : > { %v1169_v34 = vsel %vm228_vm0, %v1165_v29, -inf  ;;  %v1050_v48 = vpop.f32.mrf.mxu0 }
 0x32d   : > { %v1083_v41 = vpop.f32.mrf.mxu1  ;;  %1170 = vmax.xlane.f32.xlu1 %v1169_v34  ;;  %v1051_v62 = vadd.f32 %v1050_v48, %v1004_v59 }
 0x32e   : > { %v1084_v43 = vadd.f32 %v1083_v41, %v1047_v31 }
 0x330   : > { %v1154_v54 = vmul.f32 0.35355338, %v1084_v43 }
 0x332   : > { %v1166_v60 = vadd.f32 %v1162_v49, %v1154_v54 }
 0x334   : > { %v1172_v63 = vsel %vm228_vm0, %v1166_v60, -inf  ;;  %v1054_v10 = vpop.f32.mrf.mxu0 }
 0x335   : > { %v1087_v3 = vpop.f32.mrf.mxu1  ;;  %1173 = vmax.xlane.f32.xlu2 %v1172_v63  ;;  %v1055_v15 = vadd.f32 %v1054_v10, %v1010_v13 }
 0x336   : > { %v1088_v4 = vadd.f32 %v1087_v3, %v1051_v62 }
 0x338   : > { %v1155_v7 = vmul.f32 0.35355338, %v1088_v4 }
 0x33a   : > { %v1167_v14 = vadd.f32 %v1163_v5, %v1155_v7 }
 0x33c   : > { %v1175_v17 = vsel %vm228_vm0, %v1167_v14, -inf }
 0x33d   : > { %v1091_v18 = vpop.f32.mrf.mxu1  ;;  %1176 = vmax.xlane.f32.xlu0 %v1175_v17 }
 0x33e   : > { %v1092_v33 = vadd.f32 %v1091_v18, %v1055_v15 }
 0x340   : > { %v1156_v19 = vmul.f32 0.35355338, %v1092_v33 }
 0x342   : > { %v1168_v20 = vadd.f32 %v1164_v53, %v1156_v19 }
 0x344   : > { %v1178_v21 = vsel %vm228_vm0, %v1168_v20, -inf }
 0x345   : > { %1179 = vmax.xlane.f32.xlu2 %v1178_v21 }
 0x346   : > { %1271 = vrot.lane.b32.xlu1 %v2339_v37, %s2164_s9 }
 0x351   : > { %1267 = vrot.lane.b32.xlu0 %v2350_v51, %s2164_s9 }
 0x3a0   : > { %v1171_v8 = vpop.xlane.xlu1 %1170 }
 0x3a1   : > { %v1181_v22 = vsub.f32 %v1165_v29, %v1171_v8 }
 0x3a3   : > { %v1185_v23 = vmul.f32 1.442695, %v1181_v22 }
 0x3a5   : > { %2076 = vpow2.f32 %v1185_v23 }
 0x3a8   : > { %v1174_v24 = vpop.xlane.xlu2 %1173 }
 0x3a9   : > { %v1182_v25 = vsub.f32 %v1166_v60, %v1174_v24 }
 0x3ab   : > { %v2077_v26 = vpop.eup %2076  ;;  %v1187_v27 = vmul.f32 1.442695, %v1182_v25 }
 0x3ac   : > { %v1193_v28 = vsel %vm228_vm0, %v2077_v26, 0.0 }
 0x3ad   : > { %2078 = vpow2.f32 %v1187_v27  ;;  %1194 = vadd.xlane.f32.xlu1 %v1193_v28 }
 0x3b0   : > { %v1177_v30 = vpop.xlane.xlu0 %1176 }
 0x3b1   : > { %v1183_v31 = vsub.f32 %v1167_v14, %v1177_v30 }
 0x3b3   : > { %v2485_v34 = vpop.eup %2078  ;;  %v1189_v37 = vmul.f32 1.442695, %v1183_v31 }
 0x3b4   : > { %v1196_v51 = vsel %vm228_vm0, %v2485_v34, 0.0 }
 0x3b5   : > { %2080 = vpow2.f32 %v1189_v37  ;;  %1197 = vadd.xlane.f32.xlu2 %v1196_v51 }
 0x3b8   : > { %v1272_v29 = vpop.permute.xlu1 %1271  ;;  %v1180_v38 = vpop.xlane.xlu2 %1179 }
 0x3b9   : > { %v2489_v39 = vand.u32 4294901760, %v1272_v29  ;;  %v1184_v41 = vsub.f32 %v1168_v20, %v1180_v38 }
 0x3bb   : > { %v2491_v35 = vpop.eup %2080  ;;  %v2494_v42 = vsub.f32 %v1272_v29, %v2489_v39  ;;  %v1191_v43 = vmul.f32 1.442695, %v1184_v41  ;;  %1302 = vmatpush.msra.mxu2 %v2489_v39  ;;  %1453 = vmatpush.msrb.mxu1 %v2489_v39 }
 0x3bc   : > { %v1199_v44 = vsel %vm228_vm0, %v2491_v35, 0.0 }
 0x3bd   : > { %v1356_v48 = vand.u32 4294901760, %v2494_v42  ;;  %2082 = vpow2.f32 %v1191_v43  ;;  %1200 = vadd.xlane.f32.xlu0 %v1199_v44  ;;  %1409 = vmatpush.msrb.mxu0 %v2494_v42 }
 0x3bf   : > { %v1357_v49 = vsub.f32 %v2494_v42, %v1356_v48 }
 0x3c1   : > { %v1358_v52 = vand.u32 4294901760, %v1357_v49 }
 0x3c3   : > { %v2505_v54 = vpop.eup %2082  ;;  %1359 = vmatpush.msra.mxu3 %v1358_v52  ;;  %v1268_v57 = vpop.permute.xlu0 %1267 }
 0x3c4   : > { %v1202_v55 = vsel %vm228_vm0, %v2505_v54, 0.0  ;;  %v2513_v62 = vand.u32 4294901760, %v1268_v57 }
 0x3c5   : > { %1203 = vadd.xlane.f32.xlu0 %v1202_v55 }
 0x3c6   : > { %1265 = vrot.lane.b32.xlu1 %v2345_v47, %s2164_s9  ;;  %v2516_v40 = vsub.f32 %v1268_v57, %v2513_v62 }
 0x3c8   : > { %v1368_v7 = vand.u32 4294901760, %v2516_v40 }
 0x3ca   : > { %v1369_v18 = vsub.f32 %v2516_v40, %v1368_v7 }
 0x3cc   : > { %v1370_v30 = vand.u32 4294901760, %v1369_v18 }
 0x3cd   : > { %1269 = vrot.lane.b32.xlu2 %v2343_v46, %s2164_s9 }
 0x420   : > { %v1195_v56 = vpop.xlane.xlu1 %1194 }
 0x421   : > { %2084 = vrcp.f32 %v1195_v56  ;;  %v1216_v0 = vand.u32 2147483648, %v1195_v56  ;;  %v1214_v3 = vand.u32 2147483647, %v1195_v56  ;;  %vm1210_vm15 = vweird.f32 %v1195_v56 }
 0x423   : > { %v1217_v4 = vor.u32 1.1754944e-38, %v1216_v0  ;;  %vm1215_vm3 = vcmp.eq.f32.partialorder %v1214_v3, 8.507059e+37 }
 0x427   : > { %v2085_v59 = vpop.eup %2084 }
 0x428   : > { %v1206_v60 = vmul.f32 %v2085_v59, %v1195_v56  ;;  %v1198_v61 = vpop.xlane.xlu2 %1197  ;;  %vm1211_vm14 = vweird.f32 %v2085_v59 }
 0x429   : > { %2086 = vrcp.f32 %v1198_v61  ;;  %vm1212_vm1 = vmor %vm1210_vm15, %vm1211_vm14  ;;  %v1231_v17 = vand.u32 2147483648, %v1198_v61  ;;  %vm1225_vm5 = vweird.f32 %v1198_v61  ;;  %v1229_v53 = vand.u32 2147483647, %v1198_v61 }
 0x42a   : > { %v1207_v63 = vsub.f32 1.0, %v1206_v60 }
 0x42b   : > { %v1232_v27 = vor.u32 1.1754944e-38, %v1231_v17  ;;  %vm1230_vm7 = vcmp.eq.f32.partialorder %v1229_v53, 8.507059e+37 }
 0x42c   : > { %v1208_v1 = vmul.f32 %v2085_v59, %v1207_v63 }
 0x42e   : > { %v1209_v47 = vadd.f32 %v2085_v59, %v1208_v1 }
 0x42f   : > { %v2087_v46 = vpop.eup %2086 }
 0x430   : > { %v1213_v58 = vsel %vm1212_vm1, %v2085_v59, %v1209_v47  ;;  %v1221_v2 = vmul.f32 %v2087_v46, %v1198_v61  ;;  %v2518_v5 = vpop.xlane.xlu0 %1200  ;;  %v1270_v6 = vpop.permute.xlu2 %1269  ;;  %vm1226_vm4 = vweird.f32 %v2087_v46 }
 0x431   : > { %v1218_v9 = vsel %vm1215_vm3, %v1217_v4, %v1213_v58  ;;  %2088 = vrcp.f32 %v2518_v5  ;;  %v2522_v12 = vand.u32 4294901760, %v1270_v6  ;;  %vm2535_vm6 = vmor %vm1225_vm5, %vm1226_vm4  ;;  %v1244_v29 = vand.u32 2147483647, %v2518_v5 }
 0x432   : > { %v1219_v10 = vmul.f32 %v2077_v26, %v1218_v9  ;;  %v1222_v11 = vsub.f32 1.0, %v1221_v2  ;;  %v1246_v38 = vand.u32 2147483648, %v2518_v5  ;;  %vm1240_vm15 = vweird.f32 %v2518_v5 }
 0x433   : > { %v1361_v14 = vsub.f32 %v1270_v6, %v2522_v12  ;;  %1304 = vmatpush.msra.mxu2 %v2522_v12  ;;  %1455 = vmatpush.msrb.mxu1 %v2522_v12  ;;  %vm1245_vm3 = vcmp.eq.f32.partialorder %v1244_v29, 8.507059e+37 }
 0x434   : > { %v1223_v13 = vmul.f32 %v2087_v46, %v1222_v11  ;;  %v1278_v15 = vsel %vm228_vm0, %v1219_v10, 0  ;;  %v1247_v61 = vor.u32 1.1754944e-38, %v1246_v38 }
 0x435   : > { %v2528_v32 = vand.u32 4294901760, %v1278_v15  ;;  %v1362_v19 = vand.u32 4294901760, %v1361_v14  ;;  %1306 = vmatpush.msra.mxu2 %v2513_v62  ;;  %1412 = vmatpush.msrb.mxu0 %v1361_v14 }
 0x436   : > { %v1224_v33 = vadd.f32 %v2087_v46, %v1223_v13  ;;  %1457 = vmatpush.msrb.mxu1 %v2513_v62 }
 0x437   : > { %v2089_v20 = vpop.eup %2088  ;;  %v1310_v8 = vsub.f32 %v1278_v15, %v2528_v32  ;;  %1415 = vmatpush.msrb.mxu0 %v2516_v40  ;;  %v1363_v26 = vsub.f32 %v1361_v14, %v1362_v19 }
 0x438   : > { %v1228_v22 = vsel %vm2535_vm6, %v2087_v46, %v1224_v33  ;;  %v1236_v23 = vmul.f32 %v2089_v20, %v2518_v5  ;;  %v1266_v24 = vpop.permute.xlu1 %1265  ;;  %v2545_v25 = vpop.xlane.xlu0 %1203  ;;  %vm1241_vm14 = vweird.f32 %v2089_v20 }
 0x439   : > { %v2547_v28 = vand.u32 4294901760, %v1266_v24  ;;  %2090 = vrcp.f32 %v2545_v25  ;;  %v1364_v37 = vand.u32 4294901760, %v1363_v26  ;;  %v1311_v51 = vand.u32 4294901760, %v1310_v8  ;;  %vm1242_vm1 = vmor %vm1240_vm15, %vm1241_vm14 }
 0x43a   : > { %v1237_v31 = vsub.f32 1.0, %v1236_v23  ;;  %v1233_v43 = vsel %vm1230_vm7, %v1232_v27, %v1228_v22  ;;  %v1261_v4 = vand.u32 2147483648, %v2545_v25  ;;  %v1259_v5 = vand.u32 2147483647, %v2545_v25 }
 0x43b   : > { %v1373_v41 = vsub.f32 %v1266_v24, %v2547_v28  ;;  %1308 = vmatpush.msra.mxu2 %v2547_v28  ;;  %1459 = vmatpush.msrb.mxu1 %v2547_v28  ;;  %v1312_v49 = vsub.f32 %v1310_v8, %v1311_v51  ;;  %v1234_v52 = vmul.f32 %v2485_v34, %v1233_v43  ;;  %vm1255_vm5 = vweird.f32 %v2545_v25 }
 0x43c   : > { %v1238_v44 = vmul.f32 %v2089_v20, %v1237_v31  ;;  %1365 = vmatpush.msra.mxu3 %v1364_v37  ;;  %1463 = vmatmul.f32.vlgmr.msrb.gmra.mxu1 %v1311_v51  ;;  %vm1260_vm7 = vcmp.eq.f32.partialorder %v1259_v5, 8.507059e+37 }
 0x43d   : > { %1500 = vmatpush.msrb.mxu2 %v1356_v48  ;;  %1418 = vmatpush.msrb.mxu0 %v1373_v41  ;;  %v1374_v55 = vand.u32 4294901760, %v1373_v41  ;;  %v1313_v57 = vand.u32 4294901760, %v1312_v49  ;;  %v1281_v59 = vsel %vm228_vm0, %v1234_v52, 0 }
 0x43e   : > { %v1239_v56 = vadd.f32 %v2089_v20, %v1238_v44  ;;  %1371 = vmatpush.msra.mxu3 %v1370_v30  ;;  %1421 = vmatmul.f32.vlgmr.msrb.gmra.mxu0 %v1310_v8  ;;  %v1317_v34 = vand.u32 4294901760, %v1281_v59 }
 0x43f   : > { %v2091_v60 = vpop.eup %2090  ;;  %1504 = vmatpush.msrb.mxu2 %v1362_v19  ;;  %v1375_v63 = vsub.f32 %v1373_v41, %v1374_v55 }
 0x440   : > { %v1243_v0 = vsel %vm1242_vm1, %v2089_v20, %v1239_v56  ;;  %v1251_v42 = vmul.f32 %v2091_v60, %v2545_v25  ;;  %1314 = vmatmul.f32.vlgmr.msra.gmra.mxu2 %v1313_v57  ;;  %v1318_v1 = vsub.f32 %v1281_v59, %v1317_v34  ;;  %vm1256_vm4 = vweird.f32 %v2091_v60 }
 0x441   : > { %1508 = vmatpush.msrb.mxu2 %v1368_v7  ;;  %v1376_v48 = vand.u32 4294901760, %v1375_v63  ;;  %v1248_v3 = vsel %vm1245_vm3, %v1247_v61, %v1243_v0  ;;  %vm1257_vm6 = vmor %vm1255_vm5, %vm1256_vm4 }
 0x442   : > { %v1252_v47 = vsub.f32 1.0, %v1251_v42  ;;  %v1249_v46 = vmul.f32 %v2491_v35, %v1248_v3  ;;  %v1319_v58 = vand.u32 4294901760, %v1318_v1  ;;  %v1262_v35 = vor.u32 1.1754944e-38, %v1261_v4 }
 0x443   : > { %1512 = vmatpush.msrb.mxu2 %v1374_v55  ;;  %1377 = vmatpush.msra.mxu3 %v1376_v48 }
 0x444   : > { %v1253_v2 = vmul.f32 %v2091_v60, %v1252_v47  ;;  %1379 = vmatmul.f32.vlgmr.msra.gmra.mxu3 %v2528_v32  ;;  %v1284_v40 = vsel %vm228_vm0, %v1249_v46, 0  ;;  %1469 = vmatmul.f32.gmra.mxu1 %v1319_v58  ;;  %v1320_v6 = vsub.f32 %v1318_v1, %v1319_v58 }
 0x445   : > { %1543 = vmatpush.msrb.mxu3 %v2489_v39  ;;  %v1325_v7 = vand.u32 4294901760, %v1284_v40 }
 0x446   : > { %v1254_v9 = vadd.f32 %v2091_v60, %v1253_v2  ;;  %1426 = vmatmul.f32.gmra.mxu0 %v1318_v1  ;;  %v1321_v10 = vand.u32 4294901760, %v1320_v6 }
 0x447   : > { %1545 = vmatpush.msrb.mxu3 %v2522_v12  ;;  %v1326_v11 = vsub.f32 %v1284_v40, %v1325_v7 }
 0x448   : > { %v1258_v13 = vsel %vm1257_vm6, %v2091_v60, %v1254_v9  ;;  %1322 = vmatmul.f32.gmra.mxu2 %v1321_v10  ;;  %v227_v9 = vld [vmem:[%s2686_s3 + $0x18] sm:$0xff]  ;;  %v226_v10 = vld [vmem:[%s2686_s3 + $0x10] sm:$0xff] }
 0x449   : > { %1547 = vmatpush.msrb.mxu3 %v2513_v62  ;;  %v1327_v14 = vand.u32 4294901760, %v1326_v11  ;;  %v1263_v15 = vsel %vm1260_vm7, %v1262_v35, %v1258_v13  ;;  %v1647_v35 = vand.u32 4294901760, %v227_v9  ;;  %v1649_v13 = vand.u32 4294901760, %v226_v10 }
 0x44a   : > { %v1264_v39 = vmul.f32 %v2505_v54, %v1263_v15 }
 0x44b   : > { %1549 = vmatpush.msrb.mxu3 %v2547_v28  ;;  %v1328_v17 = vsub.f32 %v1326_v11, %v1327_v14  ;;  %1648 = vmatpush.msra.mxu0 %v1647_v35 }
 0x44c   : > { %1383 = vmatmul.f32.gmra.mxu3 %v1317_v34  ;;  %v1287_v18 = vsel %vm228_vm0, %v1264_v39, 0  ;;  %1475 = vmatmul.f32.gmra.mxu1 %v1327_v14  ;;  %v225_v14 = vld [vmem:[%s2686_s3 + $0x8] sm:$0xff]  ;;  %v1707_v39 = vsub.f32 %v226_v10, %v1649_v13 }
 0x44d   : > { %v1329_v33 = vand.u32 4294901760, %v1328_v17  ;;  %v1333_v12 = vand.u32 4294901760, %v1287_v18  ;;  %1799 = vmatpush.msra.mxu3 %v1647_v35  ;;  %v1651_v17 = vand.u32 4294901760, %v225_v14  ;;  %1650 = vmatpush.msra.mxu0 %v1649_v13 }
 0x44e   : > { %1431 = vmatmul.f32.gmra.mxu0 %v1326_v11  ;;  %v1701_v11 = vsub.f32 %v227_v9, %v1647_v35 }
 0x44f   : > { %v1334_v53 = vsub.f32 %v1287_v18, %v1333_v12  ;;  %1801 = vmatpush.msra.mxu3 %v1649_v13  ;;  %v224_v18 = vld [vmem:[%s2686_s3] sm:$0xff]  ;;  %1652 = vmatpush.msra.mxu0 %v1651_v17 }
 0x450   : > { %1330 = vmatmul.f32.gmra.mxu2 %v1329_v33  ;;  %v1702_v15 = vand.u32 4294901760, %v1701_v11 }
 0x451   : > { %v1335_v19 = vand.u32 4294901760, %v1334_v53  ;;  %1755 = vmatpush.msra.mxu2 %v1701_v11  ;;  %1803 = vmatpush.msra.mxu3 %v1651_v17 }
 0x452   : > { %v1703_v33 = vsub.f32 %v1701_v11, %v1702_v15 }
 0x453   : > { %v1336_v20 = vsub.f32 %v1334_v53, %v1335_v19  ;;  %1758 = vmatpush.msra.mxu2 %v1707_v39 }
 0x454   : > { %1387 = vmatmul.f32.gmra.mxu3 %v1325_v7  ;;  %1481 = vmatmul.f32.gmra.mxu1 %v1335_v19  ;;  %v1653_v19 = vand.u32 4294901760, %v224_v18 }
 0x455   : > { %v1337_v62 = vand.u32 4294901760, %v1336_v20  ;;  %v1704_v20 = vand.u32 4294901760, %v1703_v33 }
 0x456   : > { %1436 = vmatmul.f32.gmra.mxu0 %v1334_v53  ;;  %v1713_v53 = vsub.f32 %v225_v14, %v1651_v17  ;;  %1805 = vmatpush.msra.mxu3 %v1653_v19 }
 0x457   : > { %1654 = vmatpush.msra.mxu0 %v1653_v19  ;;  %1705 = vmatpush.msra.mxu1 %v1704_v20 }
 0x458   : > { %1338 = vmatmul.f32.gmra.mxu2 %v1337_v62 }
 0x459   : > { %1761 = vmatpush.msra.mxu2 %v1713_v53  ;;  %1846 = vmatpush.msrb.mxu0 %v1702_v15 }
 0x45c   : > { %1391 = vmatmul.f32.gmra.mxu3 %v1333_v12 }
 0x460   : > { %1514 = vmatmul.f32.vlgmr.msrb.gmra.mxu2 %v2528_v32 }
 0x464   : > { %1551 = vmatmul.f32.vlgmr.msrb.gmra.mxu3 %v2528_v32 }
 0x468   : > { %1518 = vmatmul.f32.gmra.mxu2 %v1317_v34 }
 0x46c   : > { %1555 = vmatmul.f32.gmra.mxu3 %v1317_v34 }
 0x470   : > { %1522 = vmatmul.f32.gmra.mxu2 %v1325_v7 }
 0x474   : > { %1559 = vmatmul.f32.gmra.mxu3 %v1325_v7 }
 0x478   : > { %1526 = vmatmul.f32.gmra.mxu2 %v1333_v12 }
 0x47c   : > { %1563 = vmatmul.f32.gmra.mxu3 %v1333_v12  ;;  %v1708_v12 = vand.u32 4294901760, %v1707_v39 }
 0x47e   : > { %v1709_v62 = vsub.f32 %v1707_v39, %v1708_v12  ;;  %1850 = vmatpush.msrb.mxu0 %v1708_v12 }
 0x4b9   : > { %v1464_v28 = vpop.f32.mrf.mxu1 }
 0x4bb   : > { %v1422_v25 = vpop.f32.mrf.mxu0 }
 0x4c1   : > { %v1470_v41 = vpop.f32.mrf.mxu1 }
 0x4c3   : > { %v1315_v54 = vpop.f32.mrf.mxu2  ;;  %v1427_v37 = vpop.f32.mrf.mxu0 }
 0x4c7   : > { %v1380_v21 = vpop.f32.mrf.mxu3 }
 0x4c8   : > { %v1381_v26 = vadd.f32 %v1380_v21, %v1315_v54  ;;  %v1714_v54 = vand.u32 4294901760, %v1713_v53  ;;  %v1719_v21 = vsub.f32 %v224_v18, %v1653_v19 }
 0x4c9   : > { %v1476_v61 = vpop.f32.mrf.mxu1 }
 0x4ca   : > { %v1423_v31 = vadd.f32 %v1422_v25, %v1381_v26  ;;  %1764 = vmatpush.msra.mxu2 %v1719_v21  ;;  %1854 = vmatpush.msrb.mxu0 %v1714_v54 }
 0x4cb   : > { %v1323_v8 = vpop.f32.mrf.mxu2  ;;  %v1432_v56 = vpop.f32.mrf.mxu0 }
 0x4cc   : > { %v1465_v51 = vadd.f32 %v1464_v28, %v1423_v31 }
 0x4cf   : > { %v1384_v22 = vpop.f32.mrf.mxu3 }
 0x4d0   : > { %v1385_v32 = vadd.f32 %v1384_v22, %v1323_v8  ;;  %v1710_v8 = vand.u32 4294901760, %v1709_v62  ;;  %v1715_v22 = vsub.f32 %v1713_v53, %v1714_v54 }
 0x4d1   : > { %v1482_v47 = vpop.f32.mrf.mxu1 }
 0x4d2   : > { %v1428_v44 = vadd.f32 %v1427_v37, %v1385_v32  ;;  %1711 = vmatpush.msra.mxu1 %v1710_v8 }
 0x4d3   : > { %v1331_v23 = vpop.f32.mrf.mxu2  ;;  %v1437_v42 = vpop.f32.mrf.mxu0 }
 0x4d4   : > { %v1471_v52 = vadd.f32 %v1470_v41, %v1428_v44 }
 0x4d7   : > { %v1388_v24 = vpop.f32.mrf.mxu3 }
 0x4d8   : > { %v1389_v63 = vadd.f32 %v1388_v24, %v1331_v23  ;;  %v1720_v23 = vand.u32 4294901760, %v1719_v21  ;;  %v1716_v24 = vand.u32 4294901760, %v1715_v22 }
 0x4da   : > { %v1433_v1 = vadd.f32 %v1432_v56, %v1389_v63  ;;  %v1721_v25 = vsub.f32 %v1719_v21, %v1720_v23  ;;  %1717 = vmatpush.msra.mxu1 %v1716_v24  ;;  %1858 = vmatpush.msrb.mxu0 %v1720_v23 }
 0x4db   : > { %v1339_v27 = vpop.f32.mrf.mxu2 }
 0x4dc   : > { %v1477_v46 = vadd.f32 %v1476_v61, %v1433_v1  ;;  %v1722_v26 = vand.u32 4294901760, %v1721_v25 }
 0x4de   : > { %1723 = vmatpush.msra.mxu1 %v1722_v26 }
 0x4df   : > { %v1392_v30 = vpop.f32.mrf.mxu3 }
 0x4e0   : > { %v1393_v34 = vadd.f32 %v1392_v30, %v1339_v27  ;;  %1889 = vmatpush.msrb.mxu1 %v1647_v35 }
 0x4e2   : > { %v1438_v3 = vadd.f32 %v1437_v42, %v1393_v34  ;;  %1891 = vmatpush.msrb.mxu1 %v1649_v13 }
 0x4e3   : > { %v1515_v29 = vpop.f32.mrf.mxu2 }
 0x4e4   : > { %v1516_v38 = vadd.f32 %v1515_v29, %v1465_v51  ;;  %v1483_v4 = vadd.f32 %v1482_v47, %v1438_v3  ;;  %1893 = vmatpush.msrb.mxu1 %v1651_v17 }
 0x4e6   : > { %1895 = vmatpush.msrb.mxu1 %v1653_v19 }
 0x4e7   : > { %v1552_v43 = vpop.f32.mrf.mxu3 }
 0x4e8   : > { %v2578_v49 = vadd.f32 %v1552_v43, %v1516_v38 }
 0x4ea   : > { %1583 = vrot.lane.b32.xlu1 %v2578_v49, %s2163_s8  ;;  %1571 = vrot.lane.b32.xlu2 %v2578_v49, %s2161_s6 }
 0x4eb   : > { %v1519_v55 = vpop.f32.mrf.mxu2 }
 0x4ec   : > { %v1520_v57 = vadd.f32 %v1519_v55, %v1471_v52 }
 0x4ef   : > { %v1556_v59 = vpop.f32.mrf.mxu3 }
 0x4f0   : > { %v2584_v60 = vadd.f32 %v1556_v59, %v1520_v57 }
 0x4f2   : > { %1573 = vrot.lane.b32.xlu1 %v2584_v60, %s2161_s6  ;;  %1595 = vrot.lane.b32.xlu2 %v2578_v49, %s2162_s7 }
 0x4f3   : > { %v1523_v0 = vpop.f32.mrf.mxu2 }
 0x4f4   : > { %v1524_v2 = vadd.f32 %v1523_v0, %v1477_v46 }
 0x4f7   : > { %v1560_v48 = vpop.f32.mrf.mxu3 }
 0x4f8   : > { %v2594_v6 = vadd.f32 %v1560_v48, %v1524_v2 }
 0x4fa   : > { %1597 = vrot.lane.b32.xlu1 %v2584_v60, %s2162_s7  ;;  %1585 = vrot.lane.b32.xlu2 %v2584_v60, %s2163_s8 }
 0x4fb   : > { %v1527_v58 = vpop.f32.mrf.mxu2 }
 0x4fc   : > { %v1528_v5 = vadd.f32 %v1527_v58, %v1483_v4 }
 0x4ff   : > { %v1564_v40 = vpop.f32.mrf.mxu3 }
 0x500   : > { %v2596_v7 = vadd.f32 %v1564_v40, %v1528_v5 }
 0x502   : > { %1587 = vrot.lane.b32.xlu1 %v2594_v6, %s2163_s8  ;;  %1575 = vrot.lane.b32.xlu2 %v2594_v6, %s2161_s6 }
 0x503   : > { %1589 = vrot.lane.b32.xlu0 %v2596_v7, %s2163_s8 }
 0x50a   : > { %1599 = vrot.lane.b32.xlu2 %v2594_v6, %s2162_s7  ;;  %1577 = vrot.lane.b32.xlu1 %v2596_v7, %s2161_s6  ;;  %s1928_s6 = scalar_lea.hbm %s2687_s4, %s2025_s29 }
 0x50b   : > { %s1932_s9 = sshll.u32 %s1928_s6, 4  ;;  %s1933_s9 = int_to_ptr.hbm [resolvable:$true] %s1932_s9 }
 0x50c   : > { %s2106_s10 = sshra.s32 %s1933_s9, 4  ;;  %s2107_s10 = int_to_ptr.hbm [resolvable:$true] %s2106_s10 }
 0x50d   : > { %s2108_s11 = scalar_lea.hbm %s2107_s10, 8  ;;  %p2113_p1 = scmp.lt.s32.totalorder %s2107_s10, %s2687_s4 }
 0x50e   : > { %p2109_p12 = scmp.ne.s32.totalorder %s2107_s10, %s2108_s11  ;;  %p2114_p2 = scmp.lt.s32.totalorder %s2112_s14, %s2108_s11 }
 0x510   : > { %p2110_p13 = pnand %p2109_p12, %p2228_p5  ;;  %p2115_p3 = por %p2114_p2, %p2113_p1 }
 0x512   : > { %1601 = vrot.lane.b32.xlu2 %v2596_v7, %s2162_s7  ;;  %s204_s7 = scalar_lea.vmem [#allocation2], %s2008_s28  ;;  %p2111_p0 = pneg %p2110_p13 }
 0x513   : > { %s1930_s8 = sshll.u32 %s204_s7, 4  ;;  %s1931_s8 = int_to_ptr.vmem [resolvable:$true] %s1930_s8 }
 0x514   : > { %p2116_p4 = pnand %p2115_p3, %p2111_p0 }
 0x544   : > { %v1572_v27 = vpop.permute.xlu2 %1571 }
 0x545   : > { %v1607_v30 = vsel %vm436_vm2, %v2578_v49, %v1572_v27 }
 0x54c   : > { %v1596_v28 = vpop.permute.xlu2 %1595 }
 0x554   : > { %v1586_v29 = vpop.permute.xlu2 %1585 }
 0x55c   : > { %v1584_v31 = vpop.permute.xlu1 %1583  ;;  %v1576_v57 = vpop.permute.xlu2 %1575 }
 0x55d   : > { %v1611_v37 = vsel %vm1143_vm8, %v1607_v30, %v1584_v31  ;;  %v1609_v48 = vsel %vm436_vm2, %v2594_v6, %v1576_v57 }
 0x55e   : > { %v1615_v32 = vsel %vm1148_vm9, %v1611_v37, %v1596_v28 }
 0x55f   : > { %v1619_v51 = vsel %vm2434_vm10, %v1615_v32, 0.0 }
 0x560   : > { %v1624_v38 = vsel %vm228_vm0, %v1619_v51, 0 }
 0x561   : > { %v1655_v41 = vand.u32 4294901760, %v1624_v38 }
 0x563   : > { %v1656_v43 = vsub.f32 %v1624_v38, %v1655_v41  ;;  %1725 = vmatmul.f32.vlgmr.msra.gmra.mxu1 %v1655_v41 }
 0x564   : > { %v1574_v44 = vpop.permute.xlu1 %1573 }
 0x565   : > { %1767 = vmatmul.f32.vlgmr.msra.gmra.mxu2 %v1656_v43  ;;  %v1657_v52 = vand.u32 4294901760, %v1656_v43  ;;  %v1608_v49 = vsel %vm436_vm2, %v2584_v60, %v1574_v44  ;;  %v1600_v60 = vpop.permute.xlu2 %1599 }
 0x566   : > { %v1612_v16 = vsel %vm1143_vm8, %v1608_v49, %v1586_v29 }
 0x567   : > { %1809 = vmatmul.f32.vlgmr.msra.gmra.mxu3 %v1657_v52  ;;  %v1658_v55 = vsub.f32 %v1656_v43, %v1657_v52 }
 0x569   : > { %v1659_v56 = vand.u32 4294901760, %v1658_v55 }
 0x56b   : > { %1660 = vmatmul.f32.vlgmr.msra.gmra.mxu0 %v1659_v56 }
 0x56c   : > { %v1598_v59 = vpop.permute.xlu1 %1597 }
 0x56d   : > { %v1616_v61 = vsel %vm1148_vm9, %v1612_v16, %v1598_v59  ;;  %v1602_v11 = vpop.permute.xlu2 %1601 }
 0x56e   : > { %v1620_v63 = vsel %vm2446_vm11, %v1616_v61, 0.0 }
 0x56f   : > { %v1627_v34 = vsel %vm228_vm0, %v1620_v63, 0 }
 0x570   : > { %v1663_v0 = vand.u32 4294901760, %v1627_v34 }
 0x572   : > { %1729 = vmatmul.f32.gmra.mxu1 %v1663_v0  ;;  %v1664_v42 = vsub.f32 %v1627_v34, %v1663_v0 }
 0x574   : > { %v1588_v1 = vpop.permute.xlu1 %1587  ;;  %1772 = vmatmul.f32.gmra.mxu2 %v1664_v42  ;;  %v1665_v3 = vand.u32 4294901760, %v1664_v42 }
 0x575   : > { %v1613_v47 = vsel %vm1143_vm8, %v1609_v48, %v1588_v1  ;;  %v1590_v9 = vpop.permute.xlu0 %1589 }
 0x576   : > { %v1617_v46 = vsel %vm1148_vm9, %v1613_v47, %v1600_v60  ;;  %1815 = vmatmul.f32.gmra.mxu3 %v1665_v3  ;;  %v1666_v4 = vsub.f32 %v1664_v42, %v1665_v3 }
 0x577   : > { %v1621_v36 = vsel %vm2459_vm12, %v1617_v46, 0.0 }
 0x578   : > { %v1630_v58 = vsel %vm228_vm0, %v1621_v36, 0  ;;  %v1667_v2 = vand.u32 4294901760, %v1666_v4 }
 0x579   : > { %v1671_v5 = vand.u32 4294901760, %v1630_v58 }
 0x57a   : > { %1668 = vmatmul.f32.gmra.mxu0 %v1667_v2 }
 0x57b   : > { %1733 = vmatmul.f32.gmra.mxu1 %v1671_v5  ;;  %v1672_v40 = vsub.f32 %v1630_v58, %v1671_v5 }
 0x57c   : > { %v1578_v6 = vpop.permute.xlu1 %1577 }
 0x57d   : > { %v1610_v35 = vsel %vm436_vm2, %v2596_v7, %v1578_v6  ;;  %1777 = vmatmul.f32.gmra.mxu2 %v1672_v40  ;;  %v1673_v10 = vand.u32 4294901760, %v1672_v40 }
 0x57e   : > { %v1614_v13 = vsel %vm1143_vm8, %v1610_v35, %v1590_v9 }
 0x57f   : > { %v1618_v50 = vsel %vm1148_vm9, %v1614_v13, %v1602_v11  ;;  %1821 = vmatmul.f32.gmra.mxu3 %v1673_v10  ;;  %v1674_v14 = vsub.f32 %v1672_v40, %v1673_v10 }
 0x580   : > { %v1622_v15 = vsel %vm2472_vm13, %v1618_v50, 0.0 }
 0x581   : > { %v1633_v39 = vsel %vm228_vm0, %v1622_v15, 0  ;;  %v1675_v17 = vand.u32 4294901760, %v1674_v14 }
 0x582   : > { %v1679_v18 = vand.u32 4294901760, %v1633_v39 }
 0x583   : > { %1676 = vmatmul.f32.gmra.mxu0 %v1675_v17 }
 0x584   : > { %1737 = vmatmul.f32.gmra.mxu1 %v1679_v18  ;;  %v1680_v33 = vsub.f32 %v1633_v39, %v1679_v18 }
 0x586   : > { %1782 = vmatmul.f32.gmra.mxu2 %v1680_v33  ;;  %v1681_v7 = vand.u32 4294901760, %v1680_v33 }
 0x588   : > { %1827 = vmatmul.f32.gmra.mxu3 %v1681_v7  ;;  %v1682_v12 = vsub.f32 %v1680_v33, %v1681_v7 }
 0x58a   : > { %v1683_v53 = vand.u32 4294901760, %v1682_v12 }
 0x58c   : > { %1684 = vmatmul.f32.gmra.mxu0 %v1683_v53  ;;  %1897 = vmatmul.f32.vlgmr.msrb.gmra.mxu1 %v1655_v41 }
 0x594   : > { %1860 = vmatmul.f32.vlgmr.msrb.gmra.mxu0 %v1655_v41  ;;  %1901 = vmatmul.f32.gmra.mxu1 %v1663_v0 }
 0x59c   : > { %1864 = vmatmul.f32.gmra.mxu0 %v1663_v0  ;;  %1905 = vmatmul.f32.gmra.mxu1 %v1671_v5 }
 0x5a4   : > { %1868 = vmatmul.f32.gmra.mxu0 %v1671_v5  ;;  %1909 = vmatmul.f32.gmra.mxu1 %v1679_v18 }
 0x5ac   : > { %1872 = vmatmul.f32.gmra.mxu0 %v1679_v18 }
 0x5e0   : > { %v1726_v45 = vpop.f32.mrf.mxu1 }
 0x5e8   : > { %v1661_v19 = vpop.f32.mrf.mxu0  ;;  %v1768_v22 = vpop.f32.mrf.mxu2 }
 0x5e9   : > { %v1727_v51 = vadd.f32 %v1726_v45, %v1661_v19 }
 0x5ea   : > { %v1810_v24 = vpop.f32.mrf.mxu3 }
 0x5eb   : > { %v1769_v43 = vadd.f32 %v1768_v22, %v1727_v51 }
 0x5ed   : > { %v1811_v57 = vadd.f32 %v1810_v24, %v1769_v43 }
 0x5ef   : > { %v1730_v20 = vpop.f32.mrf.mxu1 }
 0x5f7   : > { %v1669_v62 = vpop.f32.mrf.mxu0  ;;  %v1773_v26 = vpop.f32.mrf.mxu2 }
 0x5f8   : > { %v1734_v54 = vpop.f32.mrf.mxu1  ;;  %v1731_v31 = vadd.f32 %v1730_v20, %v1669_v62 }
 0x5f9   : > { %v1816_v28 = vpop.f32.mrf.mxu3 }
 0x5fa   : > { %v1774_v38 = vadd.f32 %v1773_v26, %v1731_v31 }
 0x5fc   : > { %v1817_v52 = vadd.f32 %v1816_v28, %v1774_v38 }
 0x600   : > { %v1677_v21 = vpop.f32.mrf.mxu0  ;;  %v1778_v37 = vpop.f32.mrf.mxu2 }
 0x601   : > { %v1738_v8 = vpop.f32.mrf.mxu1  ;;  %v1735_v29 = vadd.f32 %v1734_v54, %v1677_v21 }
 0x602   : > { %v1822_v41 = vpop.f32.mrf.mxu3 }
 0x603   : > { %v1779_v44 = vadd.f32 %v1778_v37, %v1735_v29 }
 0x605   : > { %v1823_v59 = vadd.f32 %v1822_v41, %v1779_v44 }
 0x609   : > { %v1685_v23 = vpop.f32.mrf.mxu0  ;;  %v1898_v25 = vpop.f32.mrf.mxu1 }
 0x60a   : > { %v1739_v55 = vadd.f32 %v1738_v8, %v1685_v23  ;;  %v1783_v61 = vpop.f32.mrf.mxu2 }
 0x60b   : > { %v1828_v48 = vpop.f32.mrf.mxu3 }
 0x60c   : > { %v1784_v63 = vadd.f32 %v1783_v61, %v1739_v55 }
 0x60e   : > { %v1829_v60 = vadd.f32 %v1828_v48, %v1784_v63 }
 0x611   : > { %v1861_v27 = vpop.f32.mrf.mxu0  ;;  %v1902_v30 = vpop.f32.mrf.mxu1 }
 0x612   : > { %v1862_v34 = vadd.f32 %v1861_v27, %v1811_v57 }
 0x614   : > { %v1899_v1 = vadd.f32 %v1898_v25, %v1862_v34 }
 0x619   : > { %v1865_v32 = vpop.f32.mrf.mxu0  ;;  %v1906_v49 = vpop.f32.mrf.mxu1 }
 0x61a   : > { %v1866_v16 = vadd.f32 %v1865_v32, %v1817_v52 }
 0x61c   : > { %v1903_v42 = vadd.f32 %v1902_v30, %v1866_v16 }
 0x61e   : > { %v1913_v46 = vadd.f32 %v1903_v42, %v1899_v1 }
 0x621   : > { %v1869_v56 = vpop.f32.mrf.mxu0  ;;  %v1910_v36 = vpop.f32.mrf.mxu1 }
 0x622   : > { %v1870_v0 = vadd.f32 %v1869_v56, %v1823_v59 }
 0x624   : > { %v1907_v3 = vadd.f32 %v1906_v49, %v1870_v0 }
 0x626   : > { %v1914_v58 = vadd.f32 %v1913_v46, %v1907_v3 }
 0x629   : > { %v1873_v47 = vpop.f32.mrf.mxu0 }
 0x62a   : > { %v1874_v4 = vadd.f32 %v1873_v47, %v1829_v60 }
 0x62c   : > { %v1911_v2 = vadd.f32 %v1910_v36, %v1874_v4 }
 0x62e   : > { %v1915_v5 = vadd.f32 %v1914_v58, %v1911_v2 }
 0x630   : > { %1916 = vst.msk [vmem:[%s204_s7] sm:$0xff] %vm228_vm0, %v1915_v5 }
 0x631   : > { %2119 = shalt.err (!%p2116_p4)
}
 0x632   : > { %2028 = dma.vmem_to_hbm [thread:$0]  (%p2228_p5), %s1931_s8, 128, %s1933_s9, %s1918_s19  }
 0x633 PF: > { %p2034_p7 = scmp.ge.s32.totalorder %s2154_s18, 2  ;;  %s1944_s23 = sand.u32 1, %s2142_s15  }
 0x634   : > { %s1945_s27 = scalar_lea.sflag [#allocation3], %s1944_s23 }
 0x635   : > { %p2031_p8 = pnand %p2034_p7, %p2232_p6 }
 0x637   : > { %p2032_p9 = pneg %p2031_p8 }
 0x639   : > { %2137 = dma.done.wait (%p2032_p9), %s1945_s27, 128  }
 0x63a   : > { %2139 = vsyncadd (%p2032_p9), %s1945_s27, 4294967168  ;;  %p14_p10 = scmp.ge.s32.totalorder %s2215_s21, 4   ;;  %s2700_s15 = smov %s2146_s16 }
 0x63b   : > { %s2701_s16 = smov %s2150_s17  ;;  %s2702_s17 = smov %s2226_s24 }
 0x63c   : > { %s2703_s18 = smov %s2215_s21  ;;  %16 = sbr.rel (!%p14_p10) target bundleno = 3 (0x3), region = 74 }
 0x641   :  { %1951 = vsyncpa [#allocation3], 1 }
 0x642   :  { %1953 = vsyncpa [#allocation3 + $0x1], 1 }

</bundles_post_ra>
